<compile_context>
chip_gen: v5e
topology: v5e:2x2
jax: 0.10.0
libtpu: 0.0.40
codegen_flags: <defaults>
</compile_context>

<pallas_src>
import functools

import jax
import jax.numpy as jnp
from jax import lax
from jax.experimental import pallas as pl
from jax.experimental.pallas import tpu as pltpu


def _round_up(x, m):
    return ((x + m - 1) // m) * m


# ----------------------------- Pallas kernel ------------------------------

def _fused_conv_pool_head_kernel(x_ref, w_ref, b_ref, mean_ref, wc_ref, bc_ref,
                                 o_ref, xsl_ref, *, H, W, align):
    """One batch tile: folded 3x3 conv -> clamp -> global-avg-pool -> head.

    x_ref   : (BT, C, H*W)   VMEM  raw images, spatially flattened (row-major)
    w_ref   : (9*C*C,)       SMEM  folded conv weights, idx = ((di*3+dj)*C+ci)*C+co
    b_ref   : (C,)           SMEM  folded conv bias
    mean_ref: (C,)           SMEM  per-channel input mean (pad value of the raw image)
    wc_ref  : (C, NCLS)      VMEM  head (classifier) weight
    bc_ref  : (1, NCLS)      VMEM  head bias
    o_ref   : (BT, 1, NCLS)  VMEM  logits for this batch tile
    xsl_ref : (C, BT, SL)    VMEM  scratch: flat image rows with mean-filled slack
    """
    BT, C, HW = x_ref.shape
    NCLS = wc_ref.shape[1]
    SL = xsl_ref.shape[2]
    inv_hw = 1.0 / float(H * W)
    f32 = jnp.float32

    # ---- hoist every scalar parameter (single SMEM read each, no re-splats in loops)
    means = [mean_ref[c] for c in range(C)]
    biases = [b_ref[c] for c in range(C)]
    wtap = [[[w_ref[(t * C + ci) * C + co] for co in range(C)]
             for ci in range(C)] for t in range(9)]

    # ---- 1) stage each (channel, image) plane as one flat lane-dense row,
    #         with mean-filled slack on both sides (on-chip "padding").
    tail = SL - align - HW
    for ci in range(C):
        xsl_ref[ci, :, pl.ds(0, align)] = jnp.full((BT, align), means[ci], f32)
        xsl_ref[ci, :, pl.ds(align + HW, tail)] = jnp.full((BT, tail), means[ci], f32)
        xsl_ref[ci, :, pl.ds(align, HW)] = x_ref[:, ci, :]

    # Row-major flattening wraps columns across rows: taps with a +/-1 column shift
    # must read the pad value (mean) at the left/right image borders instead.
    col = lax.broadcasted_iota(jnp.int32, (1, HW), 1) % W
    left_edge = col == 0
    right_edge = col == (W - 1)

    # ---- 2) folded 3x3 'same' conv: 9 shifted, static, lane-dense slices per cin,
    #         scalar-weight VPU multiply-accumulates per cout (no im2col, no MXU).
    accs = [jnp.full((BT, HW), biases[co], f32) for co in range(C)]
    for ci in range(C):
        for di in range(3):
            for dj in range(3):
                off = align + (di - 1) * W + (dj - 1)
                slab = xsl_ref[ci, :, pl.ds(off, HW)]          # (BT, HW)
                if dj == 0:
                    slab = jnp.where(left_edge, means[ci], slab)
                elif dj == 2:
                    slab = jnp.where(right_edge, means[ci], slab)
                t = di * 3 + dj
                for co in range(C):
                    accs[co] = accs[co] + wtap[t][ci][co] * slab

    # ---- 3) clamp -> global average pool -> tiny linear head (x3 never in HBM)
    logits = jnp.zeros((BT, NCLS), f32) + bc_ref[...]          # (BT, NCLS)
    for co in range(C):
        x3 = jnp.clip(accs[co], 0.0, 1.0)                      # (BT, HW)
        pooled = jnp.sum(x3, axis=1, keepdims=True) * inv_hw   # (BT, 1)
        logits = logits + pooled * wc_ref[pl.ds(co, 1), :]     # (BT, NCLS)
    o_ref[:, 0, :] = logits


# ------------------------------ parameters --------------------------------

def init_params(num_classes=8, channels=3):
    key = jax.random.PRNGKey(42)
    k1, k2, k3, k4 = jax.random.split(key, 4)
    C = channels
    # Stand-in "UNet": deterministic 3x3 same-conv (kh, kw, cin, cout) + bias.
    w_conv = jax.random.normal(k1, (3, 3, C, C), jnp.float32) * 0.1
    b_conv = jax.random.normal(k2, (C,), jnp.float32) * 0.01
    # Stand-in target_model: global-average-pool + linear classifier.
    wc = jax.random.normal(k3, (C, num_classes), jnp.float32) * 0.5
    bc = jax.random.normal(k4, (num_classes,), jnp.float32) * 0.01
    mean = jnp.full((C,), 0.5, jnp.float32)
    std = jnp.full((C,), 0.5, jnp.float32)
    return dict(w_conv=w_conv, b_conv=b_conv, wc=wc, bc=bc, mean=mean, std=std)


def _fold_affine_into_conv(params):
    """Fold (x-mean)/std (input) and y*std+mean (output) into conv weight/bias.

    Exact as long as the raw image is padded with the per-channel `mean` (the
    kernel does this on-chip), which matches zero-padding of the normalized image.
    """
    w, b = params['w_conv'], params['b_conv']          # (3,3,C,C), (C,)
    mean, std = params['mean'], params['std']          # (C,), (C,)
    w_fold = w * (std[None, None, None, :] / std[None, None, :, None])
    corr = jnp.einsum('ijco,c->o', w, mean / std)      # sum over taps & cin
    b_fold = (b - corr) * std + mean
    return w_fold, b_fold


def _choose_b_tile(B, max_tile=8):
    """Largest tile <= max_tile dividing B that keeps >=2 grid steps when B >= 2
    (so both v7x TensorCores get work); batching amortizes per-step overhead."""
    if B <= 1:
        return 1
    best = 1
    for d in range(1, min(B, max_tile) + 1):
        if B % d == 0 and B // d >= 2:
            best = d
    return best


# ------------------------------- forward ----------------------------------

def osn_net_forward(x, params, *, b_tile=None):
    B, C, H, W = x.shape
    NCLS = params['wc'].shape[1]
    HW = H * W
    f32 = jnp.float32

    if b_tile is None:
        b_tile = _choose_b_tile(B)
    assert B % b_tile == 0
    nsteps = B // b_tile

    w_fold, b_fold = _fold_affine_into_conv(params)
    w_flat = w_fold.reshape(-1).astype(f32)            # ((di*3+dj)*C+ci)*C+co
    b_flat = b_fold.astype(f32)
    mean_flat = params['mean'].astype(f32)

    # Free, contiguous reshape: last dim H*W (=256) f32 -> >=512B DMA bursts and
    # a lane-dense (multiple-of-128) block; no jnp.pad HBM pass.
    x_flat = x.reshape(B, C, HW).astype(f32)
    wc = params['wc'].astype(f32)
    bc_row = params['bc'].reshape(1, NCLS).astype(f32)

    align = _round_up(W + 2, 128)                       # low-side slack (lane aligned)
    sl = align + _round_up(HW + W + 2, 128)             # staged flat row length

    kernel = functools.partial(_fused_conv_pool_head_kernel, H=H, W=W, align=align)

    logits = pl.pallas_call(
        kernel,
        out_shape=jax.ShapeDtypeStruct((B, 1, NCLS), f32),
        grid=(nsteps,),
        in_specs=[
            pl.BlockSpec((b_tile, C, HW), lambda i: (i, 0, 0)),          # images
            pl.BlockSpec(memory_space=pltpu.MemorySpace.SMEM),           # folded conv w
            pl.BlockSpec(memory_space=pltpu.MemorySpace.SMEM),           # folded conv b
            pl.BlockSpec(memory_space=pltpu.MemorySpace.SMEM),           # channel means
            pl.BlockSpec((C, NCLS), lambda i: (0, 0)),                   # head weight
            pl.BlockSpec((1, NCLS), lambda i: (0, 0)),                   # head bias
        ],
        out_specs=pl.BlockSpec((b_tile, 1, NCLS), lambda i: (i, 0, 0)),
        scratch_shapes=[pltpu.VMEM((C, b_tile, sl), f32)],
        compiler_params=pltpu.CompilerParams(
            dimension_semantics=("parallel",)),
    )(x_flat, w_flat, b_flat, mean_flat, wc, bc_row)

    return logits.reshape(B, NCLS)


# ----------------------- pure-JAX reference (checking) ---------------------

def osn_net_reference(x, params):
    mean = params['mean'].reshape(1, -1, 1, 1)
    std = params['std'].reshape(1, -1, 1, 1)
    xn = (x - mean) / std
    y = lax.conv_general_dilated(
        xn, params['w_conv'], window_strides=(1, 1),
        padding=((1, 1), (1, 1)),
        dimension_numbers=('NCHW', 'HWIO', 'NCHW'),
        precision=lax.Precision.HIGHEST)
    y = y + params['b_conv'].reshape(1, -1, 1, 1)
    x3 = jnp.clip(y * std + mean, 0.0, 1.0)
    pooled = jnp.mean(x3, axis=(2, 3))
    return jnp.dot(pooled, params['wc'], precision=lax.Precision.HIGHEST) + params['bc']


# -------------------------------- main -------------------------------------

if __name__ == "__main__":
    B, C, H, W = 2, 3, 16, 16          # 3 channels implied by the module (RGB)
    key = jax.random.PRNGKey(0)
    x = jax.random.uniform(key, (B, C, H, W), jnp.float32)   # images in [0, 1]

    params = init_params(num_classes=8, channels=C)
    out = jax.block_until_ready(osn_net_forward(x, params))

    assert out.shape == (B, 8) and out.dtype == jnp.float32
    ref = osn_net_reference(x, params)
    assert jnp.allclose(out, ref, atol=2e-4, rtol=2e-4), (out, ref)
    print("KERNEL_OK")
</pallas_src>

<mosaic_0001>
module attributes {stable_mosaic.version = 11 : i64} {
  func.func @_fused_conv_pool_head_kernel(%arg0: i32, %arg1: memref<1x3x256xf32, #tpu.memory_space<vmem>>, %arg2: memref<81xf32, #tpu.memory_space<smem>>, %arg3: memref<3xf32, #tpu.memory_space<smem>>, %arg4: memref<3xf32, #tpu.memory_space<smem>>, %arg5: memref<3x8xf32, #tpu.memory_space<vmem>>, %arg6: memref<1x8xf32, #tpu.memory_space<vmem>>, %arg7: memref<1x1x8xf32, #tpu.memory_space<vmem>>, %arg8: memref<3x1x512xf32, #tpu.memory_space<vmem>>) attributes {dimension_semantics = [#tpu.dimension_semantics<parallel>], iteration_bounds = array<i64: 2>, scalar_prefetch = 0 : i64, scratch_operands = 1 : i64, tpu.core_type = #tpu.core_type<tc>, window_params = [{transform_indices = @transform_0, window_bounds = array<i64: 1, 3, 256>}, {transform_indices = @transform_1, window_bounds = array<i64: 81>}, {transform_indices = @transform_2, window_bounds = array<i64: 3>}, {transform_indices = @transform_3, window_bounds = array<i64: 3>}, {pipeline_mode = #tpu.pipeline_mode<synchronous>, transform_indices = @transform_4, window_bounds = array<i64: 3, 8>}, {pipeline_mode = #tpu.pipeline_mode<synchronous>, transform_indices = @transform_5, window_bounds = array<i64: 1, 8>}, {transform_indices = @transform_6, window_bounds = array<i64: 1, 1, 8>}]} {
    %c0 = arith.constant 0 : index
    %0 = memref.load %arg4[%c0] : memref<3xf32, #tpu.memory_space<smem>>
    %c1 = arith.constant 1 : index
    %1 = memref.load %arg4[%c1] : memref<3xf32, #tpu.memory_space<smem>>
    %c2 = arith.constant 2 : index
    %2 = memref.load %arg4[%c2] : memref<3xf32, #tpu.memory_space<smem>>
    %c0_0 = arith.constant 0 : index
    %3 = memref.load %arg3[%c0_0] : memref<3xf32, #tpu.memory_space<smem>>
    %c1_1 = arith.constant 1 : index
    %4 = memref.load %arg3[%c1_1] : memref<3xf32, #tpu.memory_space<smem>>
    %c2_2 = arith.constant 2 : index
    %5 = memref.load %arg3[%c2_2] : memref<3xf32, #tpu.memory_space<smem>>
    %c0_3 = arith.constant 0 : index
    %6 = memref.load %arg2[%c0_3] : memref<81xf32, #tpu.memory_space<smem>>
    %c1_4 = arith.constant 1 : index
    %7 = memref.load %arg2[%c1_4] : memref<81xf32, #tpu.memory_space<smem>>
    %c2_5 = arith.constant 2 : index
    %8 = memref.load %arg2[%c2_5] : memref<81xf32, #tpu.memory_space<smem>>
    %c3 = arith.constant 3 : index
    %9 = memref.load %arg2[%c3] : memref<81xf32, #tpu.memory_space<smem>>
    %c4 = arith.constant 4 : index
    %10 = memref.load %arg2[%c4] : memref<81xf32, #tpu.memory_space<smem>>
    %c5 = arith.constant 5 : index
    %11 = memref.load %arg2[%c5] : memref<81xf32, #tpu.memory_space<smem>>
    %c6 = arith.constant 6 : index
    %12 = memref.load %arg2[%c6] : memref<81xf32, #tpu.memory_space<smem>>
    %c7 = arith.constant 7 : index
    %13 = memref.load %arg2[%c7] : memref<81xf32, #tpu.memory_space<smem>>
    %c8 = arith.constant 8 : index
    %14 = memref.load %arg2[%c8] : memref<81xf32, #tpu.memory_space<smem>>
    %c9 = arith.constant 9 : index
    %15 = memref.load %arg2[%c9] : memref<81xf32, #tpu.memory_space<smem>>
    %c10 = arith.constant 10 : index
    %16 = memref.load %arg2[%c10] : memref<81xf32, #tpu.memory_space<smem>>
    %c11 = arith.constant 11 : index
    %17 = memref.load %arg2[%c11] : memref<81xf32, #tpu.memory_space<smem>>
    %c12 = arith.constant 12 : index
    %18 = memref.load %arg2[%c12] : memref<81xf32, #tpu.memory_space<smem>>
    %c13 = arith.constant 13 : index
    %19 = memref.load %arg2[%c13] : memref<81xf32, #tpu.memory_space<smem>>
    %c14 = arith.constant 14 : index
    %20 = memref.load %arg2[%c14] : memref<81xf32, #tpu.memory_space<smem>>
    %c15 = arith.constant 15 : index
    %21 = memref.load %arg2[%c15] : memref<81xf32, #tpu.memory_space<smem>>
    %c16 = arith.constant 16 : index
    %22 = memref.load %arg2[%c16] : memref<81xf32, #tpu.memory_space<smem>>
    %c17 = arith.constant 17 : index
    %23 = memref.load %arg2[%c17] : memref<81xf32, #tpu.memory_space<smem>>
    %c18 = arith.constant 18 : index
    %24 = memref.load %arg2[%c18] : memref<81xf32, #tpu.memory_space<smem>>
    %c19 = arith.constant 19 : index
    %25 = memref.load %arg2[%c19] : memref<81xf32, #tpu.memory_space<smem>>
    %c20 = arith.constant 20 : index
    %26 = memref.load %arg2[%c20] : memref<81xf32, #tpu.memory_space<smem>>
    %c21 = arith.constant 21 : index
    %27 = memref.load %arg2[%c21] : memref<81xf32, #tpu.memory_space<smem>>
    %c22 = arith.constant 22 : index
    %28 = memref.load %arg2[%c22] : memref<81xf32, #tpu.memory_space<smem>>
    %c23 = arith.constant 23 : index
    %29 = memref.load %arg2[%c23] : memref<81xf32, #tpu.memory_space<smem>>
    %c24 = arith.constant 24 : index
    %30 = memref.load %arg2[%c24] : memref<81xf32, #tpu.memory_space<smem>>
    %c25 = arith.constant 25 : index
    %31 = memref.load %arg2[%c25] : memref<81xf32, #tpu.memory_space<smem>>
    %c26 = arith.constant 26 : index
    %32 = memref.load %arg2[%c26] : memref<81xf32, #tpu.memory_space<smem>>
    %c27 = arith.constant 27 : index
    %33 = memref.load %arg2[%c27] : memref<81xf32, #tpu.memory_space<smem>>
    %c28 = arith.constant 28 : index
    %34 = memref.load %arg2[%c28] : memref<81xf32, #tpu.memory_space<smem>>
    %c29 = arith.constant 29 : index
    %35 = memref.load %arg2[%c29] : memref<81xf32, #tpu.memory_space<smem>>
    %c30 = arith.constant 30 : index
    %36 = memref.load %arg2[%c30] : memref<81xf32, #tpu.memory_space<smem>>
    %c31 = arith.constant 31 : index
    %37 = memref.load %arg2[%c31] : memref<81xf32, #tpu.memory_space<smem>>
    %c32 = arith.constant 32 : index
    %38 = memref.load %arg2[%c32] : memref<81xf32, #tpu.memory_space<smem>>
    %c33 = arith.constant 33 : index
    %39 = memref.load %arg2[%c33] : memref<81xf32, #tpu.memory_space<smem>>
    %c34 = arith.constant 34 : index
    %40 = memref.load %arg2[%c34] : memref<81xf32, #tpu.memory_space<smem>>
    %c35 = arith.constant 35 : index
    %41 = memref.load %arg2[%c35] : memref<81xf32, #tpu.memory_space<smem>>
    %c36 = arith.constant 36 : index
    %42 = memref.load %arg2[%c36] : memref<81xf32, #tpu.memory_space<smem>>
    %c37 = arith.constant 37 : index
    %43 = memref.load %arg2[%c37] : memref<81xf32, #tpu.memory_space<smem>>
    %c38 = arith.constant 38 : index
    %44 = memref.load %arg2[%c38] : memref<81xf32, #tpu.memory_space<smem>>
    %c39 = arith.constant 39 : index
    %45 = memref.load %arg2[%c39] : memref<81xf32, #tpu.memory_space<smem>>
    %c40 = arith.constant 40 : index
    %46 = memref.load %arg2[%c40] : memref<81xf32, #tpu.memory_space<smem>>
    %c41 = arith.constant 41 : index
    %47 = memref.load %arg2[%c41] : memref<81xf32, #tpu.memory_space<smem>>
    %c42 = arith.constant 42 : index
    %48 = memref.load %arg2[%c42] : memref<81xf32, #tpu.memory_space<smem>>
    %c43 = arith.constant 43 : index
    %49 = memref.load %arg2[%c43] : memref<81xf32, #tpu.memory_space<smem>>
    %c44 = arith.constant 44 : index
    %50 = memref.load %arg2[%c44] : memref<81xf32, #tpu.memory_space<smem>>
    %c45 = arith.constant 45 : index
    %51 = memref.load %arg2[%c45] : memref<81xf32, #tpu.memory_space<smem>>
    %c46 = arith.constant 46 : index
    %52 = memref.load %arg2[%c46] : memref<81xf32, #tpu.memory_space<smem>>
    %c47 = arith.constant 47 : index
    %53 = memref.load %arg2[%c47] : memref<81xf32, #tpu.memory_space<smem>>
    %c48 = arith.constant 48 : index
    %54 = memref.load %arg2[%c48] : memref<81xf32, #tpu.memory_space<smem>>
    %c49 = arith.constant 49 : index
    %55 = memref.load %arg2[%c49] : memref<81xf32, #tpu.memory_space<smem>>
    %c50 = arith.constant 50 : index
    %56 = memref.load %arg2[%c50] : memref<81xf32, #tpu.memory_space<smem>>
    %c51 = arith.constant 51 : index
    %57 = memref.load %arg2[%c51] : memref<81xf32, #tpu.memory_space<smem>>
    %c52 = arith.constant 52 : index
    %58 = memref.load %arg2[%c52] : memref<81xf32, #tpu.memory_space<smem>>
    %c53 = arith.constant 53 : index
    %59 = memref.load %arg2[%c53] : memref<81xf32, #tpu.memory_space<smem>>
    %c54 = arith.constant 54 : index
    %60 = memref.load %arg2[%c54] : memref<81xf32, #tpu.memory_space<smem>>
    %c55 = arith.constant 55 : index
    %61 = memref.load %arg2[%c55] : memref<81xf32, #tpu.memory_space<smem>>
    %c56 = arith.constant 56 : index
    %62 = memref.load %arg2[%c56] : memref<81xf32, #tpu.memory_space<smem>>
    %c57 = arith.constant 57 : index
    %63 = memref.load %arg2[%c57] : memref<81xf32, #tpu.memory_space<smem>>
    %c58 = arith.constant 58 : index
    %64 = memref.load %arg2[%c58] : memref<81xf32, #tpu.memory_space<smem>>
    %c59 = arith.constant 59 : index
    %65 = memref.load %arg2[%c59] : memref<81xf32, #tpu.memory_space<smem>>
    %c60 = arith.constant 60 : index
    %66 = memref.load %arg2[%c60] : memref<81xf32, #tpu.memory_space<smem>>
    %c61 = arith.constant 61 : index
    %67 = memref.load %arg2[%c61] : memref<81xf32, #tpu.memory_space<smem>>
    %c62 = arith.constant 62 : index
    %68 = memref.load %arg2[%c62] : memref<81xf32, #tpu.memory_space<smem>>
    %c63 = arith.constant 63 : index
    %69 = memref.load %arg2[%c63] : memref<81xf32, #tpu.memory_space<smem>>
    %c64 = arith.constant 64 : index
    %70 = memref.load %arg2[%c64] : memref<81xf32, #tpu.memory_space<smem>>
    %c65 = arith.constant 65 : index
    %71 = memref.load %arg2[%c65] : memref<81xf32, #tpu.memory_space<smem>>
    %c66 = arith.constant 66 : index
    %72 = memref.load %arg2[%c66] : memref<81xf32, #tpu.memory_space<smem>>
    %c67 = arith.constant 67 : index
    %73 = memref.load %arg2[%c67] : memref<81xf32, #tpu.memory_space<smem>>
    %c68 = arith.constant 68 : index
    %74 = memref.load %arg2[%c68] : memref<81xf32, #tpu.memory_space<smem>>
    %c69 = arith.constant 69 : index
    %75 = memref.load %arg2[%c69] : memref<81xf32, #tpu.memory_space<smem>>
    %c70 = arith.constant 70 : index
    %76 = memref.load %arg2[%c70] : memref<81xf32, #tpu.memory_space<smem>>
    %c71 = arith.constant 71 : index
    %77 = memref.load %arg2[%c71] : memref<81xf32, #tpu.memory_space<smem>>
    %c72 = arith.constant 72 : index
    %78 = memref.load %arg2[%c72] : memref<81xf32, #tpu.memory_space<smem>>
    %c73 = arith.constant 73 : index
    %79 = memref.load %arg2[%c73] : memref<81xf32, #tpu.memory_space<smem>>
    %c74 = arith.constant 74 : index
    %80 = memref.load %arg2[%c74] : memref<81xf32, #tpu.memory_space<smem>>
    %c75 = arith.constant 75 : index
    %81 = memref.load %arg2[%c75] : memref<81xf32, #tpu.memory_space<smem>>
    %c76 = arith.constant 76 : index
    %82 = memref.load %arg2[%c76] : memref<81xf32, #tpu.memory_space<smem>>
    %c77 = arith.constant 77 : index
    %83 = memref.load %arg2[%c77] : memref<81xf32, #tpu.memory_space<smem>>
    %c78 = arith.constant 78 : index
    %84 = memref.load %arg2[%c78] : memref<81xf32, #tpu.memory_space<smem>>
    %c79 = arith.constant 79 : index
    %85 = memref.load %arg2[%c79] : memref<81xf32, #tpu.memory_space<smem>>
    %c80 = arith.constant 80 : index
    %86 = memref.load %arg2[%c80] : memref<81xf32, #tpu.memory_space<smem>>
    %87 = vector.broadcast %0 : f32 to vector<1x128xf32>
    %c0_6 = arith.constant 0 : index
    %c0_7 = arith.constant 0 : index
    %c0_8 = arith.constant 0 : index
    %88 = vector.load %arg8[%c0_6, %c0_7, %c0_8] : memref<3x1x512xf32, #tpu.memory_space<vmem>>, vector<1x1x128xf32>
    %89 = vector.shape_cast %88 : vector<1x1x128xf32> to vector<1x128xf32>
    %90 = vector.shape_cast %87 : vector<1x128xf32> to vector<1x1x128xf32>
    tpu.vector_store %arg8[%c0_6, %c0_7, %c0_8], %90 {strides = array<i32>} : memref<3x1x512xf32, #tpu.memory_space<vmem>>, vector<1x1x128xf32>,
    %91 = vector.broadcast %0 : f32 to vector<1x128xf32>
    %c0_9 = arith.constant 0 : index
    %c0_10 = arith.constant 0 : index
    %c384 = arith.constant 384 : index
    %92 = vector.load %arg8[%c0_9, %c0_10, %c384] : memref<3x1x512xf32, #tpu.memory_space<vmem>>, vector<1x1x128xf32>
    %93 = vector.shape_cast %92 : vector<1x1x128xf32> to vector<1x128xf32>
    %94 = vector.shape_cast %91 : vector<1x128xf32> to vector<1x1x128xf32>
    tpu.vector_store %arg8[%c0_9, %c0_10, %c384], %94 {strides = array<i32>} : memref<3x1x512xf32, #tpu.memory_space<vmem>>, vector<1x1x128xf32>,
    %c0_11 = arith.constant 0 : index
    %c0_12 = arith.constant 0 : index
    %c0_13 = arith.constant 0 : index
    %95 = vector.load %arg1[%c0_11, %c0_12, %c0_13] : memref<1x3x256xf32, #tpu.memory_space<vmem>>, vector<1x1x256xf32>
    %96 = vector.shape_cast %95 : vector<1x1x256xf32> to vector<1x256xf32>
    %c0_14 = arith.constant 0 : index
    %c0_15 = arith.constant 0 : index
    %c128 = arith.constant 128 : index
    %97 = vector.load %arg8[%c0_14, %c0_15, %c128] : memref<3x1x512xf32, #tpu.memory_space<vmem>>, vector<1x1x256xf32>
    %98 = vector.shape_cast %97 : vector<1x1x256xf32> to vector<1x256xf32>
    %99 = vector.shape_cast %96 : vector<1x256xf32> to vector<1x1x256xf32>
    tpu.vector_store %arg8[%c0_14, %c0_15, %c128], %99 {strides = array<i32>} : memref<3x1x512xf32, #tpu.memory_space<vmem>>, vector<1x1x256xf32>,
    %100 = vector.broadcast %1 : f32 to vector<1x128xf32>
    %c1_16 = arith.constant 1 : index
    %c0_17 = arith.constant 0 : index
    %c0_18 = arith.constant 0 : index
    %101 = vector.load %arg8[%c1_16, %c0_17, %c0_18] : memref<3x1x512xf32, #tpu.memory_space<vmem>>, vector<1x1x128xf32>
    %102 = vector.shape_cast %101 : vector<1x1x128xf32> to vector<1x128xf32>
    %103 = vector.shape_cast %100 : vector<1x128xf32> to vector<1x1x128xf32>
    tpu.vector_store %arg8[%c1_16, %c0_17, %c0_18], %103 {strides = array<i32>} : memref<3x1x512xf32, #tpu.memory_space<vmem>>, vector<1x1x128xf32>,
    %104 = vector.broadcast %1 : f32 to vector<1x128xf32>
    %c1_19 = arith.constant 1 : index
    %c0_20 = arith.constant 0 : index
    %c384_21 = arith.constant 384 : index
    %105 = vector.load %arg8[%c1_19, %c0_20, %c384_21] : memref<3x1x512xf32, #tpu.memory_space<vmem>>, vector<1x1x128xf32>
    %106 = vector.shape_cast %105 : vector<1x1x128xf32> to vector<1x128xf32>
    %107 = vector.shape_cast %104 : vector<1x128xf32> to vector<1x1x128xf32>
    tpu.vector_store %arg8[%c1_19, %c0_20, %c384_21], %107 {strides = array<i32>} : memref<3x1x512xf32, #tpu.memory_space<vmem>>, vector<1x1x128xf32>,
    %c0_22 = arith.constant 0 : index
    %c1_23 = arith.constant 1 : index
    %c0_24 = arith.constant 0 : index
    %108 = vector.load %arg1[%c0_22, %c1_23, %c0_24] : memref<1x3x256xf32, #tpu.memory_space<vmem>>, vector<1x1x256xf32>
    %109 = vector.shape_cast %108 : vector<1x1x256xf32> to vector<1x256xf32>
    %c1_25 = arith.constant 1 : index
    %c0_26 = arith.constant 0 : index
    %c128_27 = arith.constant 128 : index
    %110 = vector.load %arg8[%c1_25, %c0_26, %c128_27] : memref<3x1x512xf32, #tpu.memory_space<vmem>>, vector<1x1x256xf32>
    %111 = vector.shape_cast %110 : vector<1x1x256xf32> to vector<1x256xf32>
    %112 = vector.shape_cast %109 : vector<1x256xf32> to vector<1x1x256xf32>
    tpu.vector_store %arg8[%c1_25, %c0_26, %c128_27], %112 {strides = array<i32>} : memref<3x1x512xf32, #tpu.memory_space<vmem>>, vector<1x1x256xf32>,
    %113 = vector.broadcast %2 : f32 to vector<1x128xf32>
    %c2_28 = arith.constant 2 : index
    %c0_29 = arith.constant 0 : index
    %c0_30 = arith.constant 0 : index
    %114 = vector.load %arg8[%c2_28, %c0_29, %c0_30] : memref<3x1x512xf32, #tpu.memory_space<vmem>>, vector<1x1x128xf32>
    %115 = vector.shape_cast %114 : vector<1x1x128xf32> to vector<1x128xf32>
    %116 = vector.shape_cast %113 : vector<1x128xf32> to vector<1x1x128xf32>
    tpu.vector_store %arg8[%c2_28, %c0_29, %c0_30], %116 {strides = array<i32>} : memref<3x1x512xf32, #tpu.memory_space<vmem>>, vector<1x1x128xf32>,
    %117 = vector.broadcast %2 : f32 to vector<1x128xf32>
    %c2_31 = arith.constant 2 : index
    %c0_32 = arith.constant 0 : index
    %c384_33 = arith.constant 384 : index
    %118 = vector.load %arg8[%c2_31, %c0_32, %c384_33] : memref<3x1x512xf32, #tpu.memory_space<vmem>>, vector<1x1x128xf32>
    %119 = vector.shape_cast %118 : vector<1x1x128xf32> to vector<1x128xf32>
    %120 = vector.shape_cast %117 : vector<1x128xf32> to vector<1x1x128xf32>
    tpu.vector_store %arg8[%c2_31, %c0_32, %c384_33], %120 {strides = array<i32>} : memref<3x1x512xf32, #tpu.memory_space<vmem>>, vector<1x1x128xf32>,
    %c0_34 = arith.constant 0 : index
    %c2_35 = arith.constant 2 : index
    %c0_36 = arith.constant 0 : index
    %121 = vector.load %arg1[%c0_34, %c2_35, %c0_36] : memref<1x3x256xf32, #tpu.memory_space<vmem>>, vector<1x1x256xf32>
    %122 = vector.shape_cast %121 : vector<1x1x256xf32> to vector<1x256xf32>
    %c2_37 = arith.constant 2 : index
    %c0_38 = arith.constant 0 : index
    %c128_39 = arith.constant 128 : index
    %123 = vector.load %arg8[%c2_37, %c0_38, %c128_39] : memref<3x1x512xf32, #tpu.memory_space<vmem>>, vector<1x1x256xf32>
    %124 = vector.shape_cast %123 : vector<1x1x256xf32> to vector<1x256xf32>
    %125 = vector.shape_cast %122 : vector<1x256xf32> to vector<1x1x256xf32>
    tpu.vector_store %arg8[%c2_37, %c0_38, %c128_39], %125 {strides = array<i32>} : memref<3x1x512xf32, #tpu.memory_space<vmem>>, vector<1x1x256xf32>,
    %126 = tpu.iota {dimensions = array<i32: 1>} : vector<1x256xi32>
    %c16_i32 = arith.constant 16 : i32
    %c0_i32 = arith.constant 0 : i32
    %127 = arith.cmpi eq, %c16_i32, %c0_i32 : i32
    %c1_i32 = arith.constant 1 : i32
    %128 = arith.select %127, %c1_i32, %c16_i32 : i32
    %129 = vector.broadcast %128 : i32 to vector<1x256xi32>
    %130 = arith.remsi %126, %129 : vector<1x256xi32>
    %c0_i32_40 = arith.constant 0 : i32
    %131 = vector.broadcast %c0_i32_40 : i32 to vector<1x256xi32>
    %132 = arith.cmpi ne, %130, %131 : vector<1x256xi32>
    %c0_i32_41 = arith.constant 0 : i32
    %133 = vector.broadcast %c0_i32_41 : i32 to vector<1x256xi32>
    %134 = arith.cmpi slt, %130, %133 : vector<1x256xi32>
    %c0_i32_42 = arith.constant 0 : i32
    %135 = arith.cmpi slt, %128, %c0_i32_42 : i32
    %136 = vector.broadcast %135 : i1 to vector<1x256xi1>
    %137 = vector.broadcast %136 : vector<1x256xi1> to vector<1x256xi1>
    %138 = arith.xori %134, %137 : vector<1x256xi1>
    %139 = arith.andi %138, %132 : vector<1x256xi1>
    %140 = vector.broadcast %128 : i32 to vector<1x256xi32>
    %141 = arith.addi %130, %140 : vector<1x256xi32>
    %142 = arith.select %139, %141, %130 : vector<1x256xi1>, vector<1x256xi32>
    %c0_i32_43 = arith.constant 0 : i32
    %143 = vector.broadcast %c0_i32_43 : i32 to vector<1x256xi32>
    %144 = arith.cmpi eq, %142, %143 : vector<1x256xi32>
    %c15_i32 = arith.constant 15 : i32
    %145 = vector.broadcast %c15_i32 : i32 to vector<1x256xi32>
    %146 = arith.cmpi eq, %142, %145 : vector<1x256xi32>
    %147 = vector.broadcast %3 : f32 to vector<1x256xf32>
    %148 = vector.broadcast %4 : f32 to vector<1x256xf32>
    %149 = vector.broadcast %5 : f32 to vector<1x256xf32>
    %c0_44 = arith.constant 0 : index
    %c0_45 = arith.constant 0 : index
    %c111 = arith.constant 111 : index
    %150 = vector.load %arg8[%c0_44, %c0_45, %c111] : memref<3x1x512xf32, #tpu.memory_space<vmem>>, vector<1x1x256xf32>
    %151 = vector.shape_cast %150 : vector<1x1x256xf32> to vector<1x256xf32>
    %152 = vector.broadcast %0 : f32 to vector<1x256xf32>
    %153 = arith.select %144, %152, %151 : vector<1x256xi1>, vector<1x256xf32>
    %154 = vector.broadcast %6 : f32 to vector<1x256xf32>
    %155 = arith.mulf %154, %153 : vector<1x256xf32>
    %156 = arith.addf %147, %155 : vector<1x256xf32>
    %157 = vector.broadcast %7 : f32 to vector<1x256xf32>
    %158 = arith.mulf %157, %153 : vector<1x256xf32>
    %159 = arith.addf %148, %158 : vector<1x256xf32>
    %160 = vector.broadcast %8 : f32 to vector<1x256xf32>
    %161 = arith.mulf %160, %153 : vector<1x256xf32>
    %162 = arith.addf %149, %161 : vector<1x256xf32>
    %c0_46 = arith.constant 0 : index
    %c0_47 = arith.constant 0 : index
    %c112 = arith.constant 112 : index
    %163 = vector.load %arg8[%c0_46, %c0_47, %c112] : memref<3x1x512xf32, #tpu.memory_space<vmem>>, vector<1x1x256xf32>
    %164 = vector.shape_cast %163 : vector<1x1x256xf32> to vector<1x256xf32>
    %165 = vector.broadcast %15 : f32 to vector<1x256xf32>
    %166 = arith.mulf %165, %164 : vector<1x256xf32>
    %167 = arith.addf %156, %166 : vector<1x256xf32>
    %168 = vector.broadcast %16 : f32 to vector<1x256xf32>
    %169 = arith.mulf %168, %164 : vector<1x256xf32>
    %170 = arith.addf %159, %169 : vector<1x256xf32>
    %171 = vector.broadcast %17 : f32 to vector<1x256xf32>
    %172 = arith.mulf %171, %164 : vector<1x256xf32>
    %173 = arith.addf %162, %172 : vector<1x256xf32>
    %c0_48 = arith.constant 0 : index
    %c0_49 = arith.constant 0 : index
    %c113 = arith.constant 113 : index
    %174 = vector.load %arg8[%c0_48, %c0_49, %c113] : memref<3x1x512xf32, #tpu.memory_space<vmem>>, vector<1x1x256xf32>
    %175 = vector.shape_cast %174 : vector<1x1x256xf32> to vector<1x256xf32>
    %176 = vector.broadcast %0 : f32 to vector<1x256xf32>
    %177 = arith.select %146, %176, %175 : vector<1x256xi1>, vector<1x256xf32>
    %178 = vector.broadcast %24 : f32 to vector<1x256xf32>
    %179 = arith.mulf %178, %177 : vector<1x256xf32>
    %180 = arith.addf %167, %179 : vector<1x256xf32>
    %181 = vector.broadcast %25 : f32 to vector<1x256xf32>
    %182 = arith.mulf %181, %177 : vector<1x256xf32>
    %183 = arith.addf %170, %182 : vector<1x256xf32>
    %184 = vector.broadcast %26 : f32 to vector<1x256xf32>
    %185 = arith.mulf %184, %177 : vector<1x256xf32>
    %186 = arith.addf %173, %185 : vector<1x256xf32>
    %c0_50 = arith.constant 0 : index
    %c0_51 = arith.constant 0 : index
    %c127 = arith.constant 127 : index
    %187 = vector.load %arg8[%c0_50, %c0_51, %c127] : memref<3x1x512xf32, #tpu.memory_space<vmem>>, vector<1x1x256xf32>
    %188 = vector.shape_cast %187 : vector<1x1x256xf32> to vector<1x256xf32>
    %189 = vector.broadcast %0 : f32 to vector<1x256xf32>
    %190 = arith.select %144, %189, %188 : vector<1x256xi1>, vector<1x256xf32>
    %191 = vector.broadcast %33 : f32 to vector<1x256xf32>
    %192 = arith.mulf %191, %190 : vector<1x256xf32>
    %193 = arith.addf %180, %192 : vector<1x256xf32>
    %194 = vector.broadcast %34 : f32 to vector<1x256xf32>
    %195 = arith.mulf %194, %190 : vector<1x256xf32>
    %196 = arith.addf %183, %195 : vector<1x256xf32>
    %197 = vector.broadcast %35 : f32 to vector<1x256xf32>
    %198 = arith.mulf %197, %190 : vector<1x256xf32>
    %199 = arith.addf %186, %198 : vector<1x256xf32>
    %c0_52 = arith.constant 0 : index
    %c0_53 = arith.constant 0 : index
    %c128_54 = arith.constant 128 : index
    %200 = vector.load %arg8[%c0_52, %c0_53, %c128_54] : memref<3x1x512xf32, #tpu.memory_space<vmem>>, vector<1x1x256xf32>
    %201 = vector.shape_cast %200 : vector<1x1x256xf32> to vector<1x256xf32>
    %202 = vector.broadcast %42 : f32 to vector<1x256xf32>
    %203 = arith.mulf %202, %201 : vector<1x256xf32>
    %204 = arith.addf %193, %203 : vector<1x256xf32>
    %205 = vector.broadcast %43 : f32 to vector<1x256xf32>
    %206 = arith.mulf %205, %201 : vector<1x256xf32>
    %207 = arith.addf %196, %206 : vector<1x256xf32>
    %208 = vector.broadcast %44 : f32 to vector<1x256xf32>
    %209 = arith.mulf %208, %201 : vector<1x256xf32>
    %210 = arith.addf %199, %209 : vector<1x256xf32>
    %c0_55 = arith.constant 0 : index
    %c0_56 = arith.constant 0 : index
    %c129 = arith.constant 129 : index
    %211 = vector.load %arg8[%c0_55, %c0_56, %c129] : memref<3x1x512xf32, #tpu.memory_space<vmem>>, vector<1x1x256xf32>
    %212 = vector.shape_cast %211 : vector<1x1x256xf32> to vector<1x256xf32>
    %213 = vector.broadcast %0 : f32 to vector<1x256xf32>
    %214 = arith.select %146, %213, %212 : vector<1x256xi1>, vector<1x256xf32>
    %215 = vector.broadcast %51 : f32 to vector<1x256xf32>
    %216 = arith.mulf %215, %214 : vector<1x256xf32>
    %217 = arith.addf %204, %216 : vector<1x256xf32>
    %218 = vector.broadcast %52 : f32 to vector<1x256xf32>
    %219 = arith.mulf %218, %214 : vector<1x256xf32>
    %220 = arith.addf %207, %219 : vector<1x256xf32>
    %221 = vector.broadcast %53 : f32 to vector<1x256xf32>
    %222 = arith.mulf %221, %214 : vector<1x256xf32>
    %223 = arith.addf %210, %222 : vector<1x256xf32>
    %c0_57 = arith.constant 0 : index
    %c0_58 = arith.constant 0 : index
    %c143 = arith.constant 143 : index
    %224 = vector.load %arg8[%c0_57, %c0_58, %c143] : memref<3x1x512xf32, #tpu.memory_space<vmem>>, vector<1x1x256xf32>
    %225 = vector.shape_cast %224 : vector<1x1x256xf32> to vector<1x256xf32>
    %226 = vector.broadcast %0 : f32 to vector<1x256xf32>
    %227 = arith.select %144, %226, %225 : vector<1x256xi1>, vector<1x256xf32>
    %228 = vector.broadcast %60 : f32 to vector<1x256xf32>
    %229 = arith.mulf %228, %227 : vector<1x256xf32>
    %230 = arith.addf %217, %229 : vector<1x256xf32>
    %231 = vector.broadcast %61 : f32 to vector<1x256xf32>
    %232 = arith.mulf %231, %227 : vector<1x256xf32>
    %233 = arith.addf %220, %232 : vector<1x256xf32>
    %234 = vector.broadcast %62 : f32 to vector<1x256xf32>
    %235 = arith.mulf %234, %227 : vector<1x256xf32>
    %236 = arith.addf %223, %235 : vector<1x256xf32>
    %c0_59 = arith.constant 0 : index
    %c0_60 = arith.constant 0 : index
    %c144 = arith.constant 144 : index
    %237 = vector.load %arg8[%c0_59, %c0_60, %c144] : memref<3x1x512xf32, #tpu.memory_space<vmem>>, vector<1x1x256xf32>
    %238 = vector.shape_cast %237 : vector<1x1x256xf32> to vector<1x256xf32>
    %239 = vector.broadcast %69 : f32 to vector<1x256xf32>
    %240 = arith.mulf %239, %238 : vector<1x256xf32>
    %241 = arith.addf %230, %240 : vector<1x256xf32>
    %242 = vector.broadcast %70 : f32 to vector<1x256xf32>
    %243 = arith.mulf %242, %238 : vector<1x256xf32>
    %244 = arith.addf %233, %243 : vector<1x256xf32>
    %245 = vector.broadcast %71 : f32 to vector<1x256xf32>
    %246 = arith.mulf %245, %238 : vector<1x256xf32>
    %247 = arith.addf %236, %246 : vector<1x256xf32>
    %c0_61 = arith.constant 0 : index
    %c0_62 = arith.constant 0 : index
    %c145 = arith.constant 145 : index
    %248 = vector.load %arg8[%c0_61, %c0_62, %c145] : memref<3x1x512xf32, #tpu.memory_space<vmem>>, vector<1x1x256xf32>
    %249 = vector.shape_cast %248 : vector<1x1x256xf32> to vector<1x256xf32>
    %250 = vector.broadcast %0 : f32 to vector<1x256xf32>
    %251 = arith.select %146, %250, %249 : vector<1x256xi1>, vector<1x256xf32>
    %252 = vector.broadcast %78 : f32 to vector<1x256xf32>
    %253 = arith.mulf %252, %251 : vector<1x256xf32>
    %254 = arith.addf %241, %253 : vector<1x256xf32>
    %255 = vector.broadcast %79 : f32 to vector<1x256xf32>
    %256 = arith.mulf %255, %251 : vector<1x256xf32>
    %257 = arith.addf %244, %256 : vector<1x256xf32>
    %258 = vector.broadcast %80 : f32 to vector<1x256xf32>
    %259 = arith.mulf %258, %251 : vector<1x256xf32>
    %260 = arith.addf %247, %259 : vector<1x256xf32>
    %c1_63 = arith.constant 1 : index
    %c0_64 = arith.constant 0 : index
    %c111_65 = arith.constant 111 : index
    %261 = vector.load %arg8[%c1_63, %c0_64, %c111_65] : memref<3x1x512xf32, #tpu.memory_space<vmem>>, vector<1x1x256xf32>
    %262 = vector.shape_cast %261 : vector<1x1x256xf32> to vector<1x256xf32>
    %263 = vector.broadcast %1 : f32 to vector<1x256xf32>
    %264 = arith.select %144, %263, %262 : vector<1x256xi1>, vector<1x256xf32>
    %265 = vector.broadcast %9 : f32 to vector<1x256xf32>
    %266 = arith.mulf %265, %264 : vector<1x256xf32>
    %267 = arith.addf %254, %266 : vector<1x256xf32>
    %268 = vector.broadcast %10 : f32 to vector<1x256xf32>
    %269 = arith.mulf %268, %264 : vector<1x256xf32>
    %270 = arith.addf %257, %269 : vector<1x256xf32>
    %271 = vector.broadcast %11 : f32 to vector<1x256xf32>
    %272 = arith.mulf %271, %264 : vector<1x256xf32>
    %273 = arith.addf %260, %272 : vector<1x256xf32>
    %c1_66 = arith.constant 1 : index
    %c0_67 = arith.constant 0 : index
    %c112_68 = arith.constant 112 : index
    %274 = vector.load %arg8[%c1_66, %c0_67, %c112_68] : memref<3x1x512xf32, #tpu.memory_space<vmem>>, vector<1x1x256xf32>
    %275 = vector.shape_cast %274 : vector<1x1x256xf32> to vector<1x256xf32>
    %276 = vector.broadcast %18 : f32 to vector<1x256xf32>
    %277 = arith.mulf %276, %275 : vector<1x256xf32>
    %278 = arith.addf %267, %277 : vector<1x256xf32>
    %279 = vector.broadcast %19 : f32 to vector<1x256xf32>
    %280 = arith.mulf %279, %275 : vector<1x256xf32>
    %281 = arith.addf %270, %280 : vector<1x256xf32>
    %282 = vector.broadcast %20 : f32 to vector<1x256xf32>
    %283 = arith.mulf %282, %275 : vector<1x256xf32>
    %284 = arith.addf %273, %283 : vector<1x256xf32>
    %c1_69 = arith.constant 1 : index
    %c0_70 = arith.constant 0 : index
    %c113_71 = arith.constant 113 : index
    %285 = vector.load %arg8[%c1_69, %c0_70, %c113_71] : memref<3x1x512xf32, #tpu.memory_space<vmem>>, vector<1x1x256xf32>
    %286 = vector.shape_cast %285 : vector<1x1x256xf32> to vector<1x256xf32>
    %287 = vector.broadcast %1 : f32 to vector<1x256xf32>
    %288 = arith.select %146, %287, %286 : vector<1x256xi1>, vector<1x256xf32>
    %289 = vector.broadcast %27 : f32 to vector<1x256xf32>
    %290 = arith.mulf %289, %288 : vector<1x256xf32>
    %291 = arith.addf %278, %290 : vector<1x256xf32>
    %292 = vector.broadcast %28 : f32 to vector<1x256xf32>
    %293 = arith.mulf %292, %288 : vector<1x256xf32>
    %294 = arith.addf %281, %293 : vector<1x256xf32>
    %295 = vector.broadcast %29 : f32 to vector<1x256xf32>
    %296 = arith.mulf %295, %288 : vector<1x256xf32>
    %297 = arith.addf %284, %296 : vector<1x256xf32>
    %c1_72 = arith.constant 1 : index
    %c0_73 = arith.constant 0 : index
    %c127_74 = arith.constant 127 : index
    %298 = vector.load %arg8[%c1_72, %c0_73, %c127_74] : memref<3x1x512xf32, #tpu.memory_space<vmem>>, vector<1x1x256xf32>
    %299 = vector.shape_cast %298 : vector<1x1x256xf32> to vector<1x256xf32>
    %300 = vector.broadcast %1 : f32 to vector<1x256xf32>
    %301 = arith.select %144, %300, %299 : vector<1x256xi1>, vector<1x256xf32>
    %302 = vector.broadcast %36 : f32 to vector<1x256xf32>
    %303 = arith.mulf %302, %301 : vector<1x256xf32>
    %304 = arith.addf %291, %303 : vector<1x256xf32>
    %305 = vector.broadcast %37 : f32 to vector<1x256xf32>
    %306 = arith.mulf %305, %301 : vector<1x256xf32>
    %307 = arith.addf %294, %306 : vector<1x256xf32>
    %308 = vector.broadcast %38 : f32 to vector<1x256xf32>
    %309 = arith.mulf %308, %301 : vector<1x256xf32>
    %310 = arith.addf %297, %309 : vector<1x256xf32>
    %c1_75 = arith.constant 1 : index
    %c0_76 = arith.constant 0 : index
    %c128_77 = arith.constant 128 : index
    %311 = vector.load %arg8[%c1_75, %c0_76, %c128_77] : memref<3x1x512xf32, #tpu.memory_space<vmem>>, vector<1x1x256xf32>
    %312 = vector.shape_cast %311 : vector<1x1x256xf32> to vector<1x256xf32>
    %313 = vector.broadcast %45 : f32 to vector<1x256xf32>
    %314 = arith.mulf %313, %312 : vector<1x256xf32>
    %315 = arith.addf %304, %314 : vector<1x256xf32>
    %316 = vector.broadcast %46 : f32 to vector<1x256xf32>
    %317 = arith.mulf %316, %312 : vector<1x256xf32>
    %318 = arith.addf %307, %317 : vector<1x256xf32>
    %319 = vector.broadcast %47 : f32 to vector<1x256xf32>
    %320 = arith.mulf %319, %312 : vector<1x256xf32>
    %321 = arith.addf %310, %320 : vector<1x256xf32>
    %c1_78 = arith.constant 1 : index
    %c0_79 = arith.constant 0 : index
    %c129_80 = arith.constant 129 : index
    %322 = vector.load %arg8[%c1_78, %c0_79, %c129_80] : memref<3x1x512xf32, #tpu.memory_space<vmem>>, vector<1x1x256xf32>
    %323 = vector.shape_cast %322 : vector<1x1x256xf32> to vector<1x256xf32>
    %324 = vector.broadcast %1 : f32 to vector<1x256xf32>
    %325 = arith.select %146, %324, %323 : vector<1x256xi1>, vector<1x256xf32>
    %326 = vector.broadcast %54 : f32 to vector<1x256xf32>
    %327 = arith.mulf %326, %325 : vector<1x256xf32>
    %328 = arith.addf %315, %327 : vector<1x256xf32>
    %329 = vector.broadcast %55 : f32 to vector<1x256xf32>
    %330 = arith.mulf %329, %325 : vector<1x256xf32>
    %331 = arith.addf %318, %330 : vector<1x256xf32>
    %332 = vector.broadcast %56 : f32 to vector<1x256xf32>
    %333 = arith.mulf %332, %325 : vector<1x256xf32>
    %334 = arith.addf %321, %333 : vector<1x256xf32>
    %c1_81 = arith.constant 1 : index
    %c0_82 = arith.constant 0 : index
    %c143_83 = arith.constant 143 : index
    %335 = vector.load %arg8[%c1_81, %c0_82, %c143_83] : memref<3x1x512xf32, #tpu.memory_space<vmem>>, vector<1x1x256xf32>
    %336 = vector.shape_cast %335 : vector<1x1x256xf32> to vector<1x256xf32>
    %337 = vector.broadcast %1 : f32 to vector<1x256xf32>
    %338 = arith.select %144, %337, %336 : vector<1x256xi1>, vector<1x256xf32>
    %339 = vector.broadcast %63 : f32 to vector<1x256xf32>
    %340 = arith.mulf %339, %338 : vector<1x256xf32>
    %341 = arith.addf %328, %340 : vector<1x256xf32>
    %342 = vector.broadcast %64 : f32 to vector<1x256xf32>
    %343 = arith.mulf %342, %338 : vector<1x256xf32>
    %344 = arith.addf %331, %343 : vector<1x256xf32>
    %345 = vector.broadcast %65 : f32 to vector<1x256xf32>
    %346 = arith.mulf %345, %338 : vector<1x256xf32>
    %347 = arith.addf %334, %346 : vector<1x256xf32>
    %c1_84 = arith.constant 1 : index
    %c0_85 = arith.constant 0 : index
    %c144_86 = arith.constant 144 : index
    %348 = vector.load %arg8[%c1_84, %c0_85, %c144_86] : memref<3x1x512xf32, #tpu.memory_space<vmem>>, vector<1x1x256xf32>
    %349 = vector.shape_cast %348 : vector<1x1x256xf32> to vector<1x256xf32>
    %350 = vector.broadcast %72 : f32 to vector<1x256xf32>
    %351 = arith.mulf %350, %349 : vector<1x256xf32>
    %352 = arith.addf %341, %351 : vector<1x256xf32>
    %353 = vector.broadcast %73 : f32 to vector<1x256xf32>
    %354 = arith.mulf %353, %349 : vector<1x256xf32>
    %355 = arith.addf %344, %354 : vector<1x256xf32>
    %356 = vector.broadcast %74 : f32 to vector<1x256xf32>
    %357 = arith.mulf %356, %349 : vector<1x256xf32>
    %358 = arith.addf %347, %357 : vector<1x256xf32>
    %c1_87 = arith.constant 1 : index
    %c0_88 = arith.constant 0 : index
    %c145_89 = arith.constant 145 : index
    %359 = vector.load %arg8[%c1_87, %c0_88, %c145_89] : memref<3x1x512xf32, #tpu.memory_space<vmem>>, vector<1x1x256xf32>
    %360 = vector.shape_cast %359 : vector<1x1x256xf32> to vector<1x256xf32>
    %361 = vector.broadcast %1 : f32 to vector<1x256xf32>
    %362 = arith.select %146, %361, %360 : vector<1x256xi1>, vector<1x256xf32>
    %363 = vector.broadcast %81 : f32 to vector<1x256xf32>
    %364 = arith.mulf %363, %362 : vector<1x256xf32>
    %365 = arith.addf %352, %364 : vector<1x256xf32>
    %366 = vector.broadcast %82 : f32 to vector<1x256xf32>
    %367 = arith.mulf %366, %362 : vector<1x256xf32>
    %368 = arith.addf %355, %367 : vector<1x256xf32>
    %369 = vector.broadcast %83 : f32 to vector<1x256xf32>
    %370 = arith.mulf %369, %362 : vector<1x256xf32>
    %371 = arith.addf %358, %370 : vector<1x256xf32>
    %c2_90 = arith.constant 2 : index
    %c0_91 = arith.constant 0 : index
    %c111_92 = arith.constant 111 : index
    %372 = vector.load %arg8[%c2_90, %c0_91, %c111_92] : memref<3x1x512xf32, #tpu.memory_space<vmem>>, vector<1x1x256xf32>
    %373 = vector.shape_cast %372 : vector<1x1x256xf32> to vector<1x256xf32>
    %374 = vector.broadcast %2 : f32 to vector<1x256xf32>
    %375 = arith.select %144, %374, %373 : vector<1x256xi1>, vector<1x256xf32>
    %376 = vector.broadcast %12 : f32 to vector<1x256xf32>
    %377 = arith.mulf %376, %375 : vector<1x256xf32>
    %378 = arith.addf %365, %377 : vector<1x256xf32>
    %379 = vector.broadcast %13 : f32 to vector<1x256xf32>
    %380 = arith.mulf %379, %375 : vector<1x256xf32>
    %381 = arith.addf %368, %380 : vector<1x256xf32>
    %382 = vector.broadcast %14 : f32 to vector<1x256xf32>
    %383 = arith.mulf %382, %375 : vector<1x256xf32>
    %384 = arith.addf %371, %383 : vector<1x256xf32>
    %c2_93 = arith.constant 2 : index
    %c0_94 = arith.constant 0 : index
    %c112_95 = arith.constant 112 : index
    %385 = vector.load %arg8[%c2_93, %c0_94, %c112_95] : memref<3x1x512xf32, #tpu.memory_space<vmem>>, vector<1x1x256xf32>
    %386 = vector.shape_cast %385 : vector<1x1x256xf32> to vector<1x256xf32>
    %387 = vector.broadcast %21 : f32 to vector<1x256xf32>
    %388 = arith.mulf %387, %386 : vector<1x256xf32>
    %389 = arith.addf %378, %388 : vector<1x256xf32>
    %390 = vector.broadcast %22 : f32 to vector<1x256xf32>
    %391 = arith.mulf %390, %386 : vector<1x256xf32>
    %392 = arith.addf %381, %391 : vector<1x256xf32>
    %393 = vector.broadcast %23 : f32 to vector<1x256xf32>
    %394 = arith.mulf %393, %386 : vector<1x256xf32>
    %395 = arith.addf %384, %394 : vector<1x256xf32>
    %c2_96 = arith.constant 2 : index
    %c0_97 = arith.constant 0 : index
    %c113_98 = arith.constant 113 : index
    %396 = vector.load %arg8[%c2_96, %c0_97, %c113_98] : memref<3x1x512xf32, #tpu.memory_space<vmem>>, vector<1x1x256xf32>
    %397 = vector.shape_cast %396 : vector<1x1x256xf32> to vector<1x256xf32>
    %398 = vector.broadcast %2 : f32 to vector<1x256xf32>
    %399 = arith.select %146, %398, %397 : vector<1x256xi1>, vector<1x256xf32>
    %400 = vector.broadcast %30 : f32 to vector<1x256xf32>
    %401 = arith.mulf %400, %399 : vector<1x256xf32>
    %402 = arith.addf %389, %401 : vector<1x256xf32>
    %403 = vector.broadcast %31 : f32 to vector<1x256xf32>
    %404 = arith.mulf %403, %399 : vector<1x256xf32>
    %405 = arith.addf %392, %404 : vector<1x256xf32>
    %406 = vector.broadcast %32 : f32 to vector<1x256xf32>
    %407 = arith.mulf %406, %399 : vector<1x256xf32>
    %408 = arith.addf %395, %407 : vector<1x256xf32>
    %c2_99 = arith.constant 2 : index
    %c0_100 = arith.constant 0 : index
    %c127_101 = arith.constant 127 : index
    %409 = vector.load %arg8[%c2_99, %c0_100, %c127_101] : memref<3x1x512xf32, #tpu.memory_space<vmem>>, vector<1x1x256xf32>
    %410 = vector.shape_cast %409 : vector<1x1x256xf32> to vector<1x256xf32>
    %411 = vector.broadcast %2 : f32 to vector<1x256xf32>
    %412 = arith.select %144, %411, %410 : vector<1x256xi1>, vector<1x256xf32>
    %413 = vector.broadcast %39 : f32 to vector<1x256xf32>
    %414 = arith.mulf %413, %412 : vector<1x256xf32>
    %415 = arith.addf %402, %414 : vector<1x256xf32>
    %416 = vector.broadcast %40 : f32 to vector<1x256xf32>
    %417 = arith.mulf %416, %412 : vector<1x256xf32>
    %418 = arith.addf %405, %417 : vector<1x256xf32>
    %419 = vector.broadcast %41 : f32 to vector<1x256xf32>
    %420 = arith.mulf %419, %412 : vector<1x256xf32>
    %421 = arith.addf %408, %420 : vector<1x256xf32>
    %c2_102 = arith.constant 2 : index
    %c0_103 = arith.constant 0 : index
    %c128_104 = arith.constant 128 : index
    %422 = vector.load %arg8[%c2_102, %c0_103, %c128_104] : memref<3x1x512xf32, #tpu.memory_space<vmem>>, vector<1x1x256xf32>
    %423 = vector.shape_cast %422 : vector<1x1x256xf32> to vector<1x256xf32>
    %424 = vector.broadcast %48 : f32 to vector<1x256xf32>
    %425 = arith.mulf %424, %423 : vector<1x256xf32>
    %426 = arith.addf %415, %425 : vector<1x256xf32>
    %427 = vector.broadcast %49 : f32 to vector<1x256xf32>
    %428 = arith.mulf %427, %423 : vector<1x256xf32>
    %429 = arith.addf %418, %428 : vector<1x256xf32>
    %430 = vector.broadcast %50 : f32 to vector<1x256xf32>
    %431 = arith.mulf %430, %423 : vector<1x256xf32>
    %432 = arith.addf %421, %431 : vector<1x256xf32>
    %c2_105 = arith.constant 2 : index
    %c0_106 = arith.constant 0 : index
    %c129_107 = arith.constant 129 : index
    %433 = vector.load %arg8[%c2_105, %c0_106, %c129_107] : memref<3x1x512xf32, #tpu.memory_space<vmem>>, vector<1x1x256xf32>
    %434 = vector.shape_cast %433 : vector<1x1x256xf32> to vector<1x256xf32>
    %435 = vector.broadcast %2 : f32 to vector<1x256xf32>
    %436 = arith.select %146, %435, %434 : vector<1x256xi1>, vector<1x256xf32>
    %437 = vector.broadcast %57 : f32 to vector<1x256xf32>
    %438 = arith.mulf %437, %436 : vector<1x256xf32>
    %439 = arith.addf %426, %438 : vector<1x256xf32>
    %440 = vector.broadcast %58 : f32 to vector<1x256xf32>
    %441 = arith.mulf %440, %436 : vector<1x256xf32>
    %442 = arith.addf %429, %441 : vector<1x256xf32>
    %443 = vector.broadcast %59 : f32 to vector<1x256xf32>
    %444 = arith.mulf %443, %436 : vector<1x256xf32>
    %445 = arith.addf %432, %444 : vector<1x256xf32>
    %c2_108 = arith.constant 2 : index
    %c0_109 = arith.constant 0 : index
    %c143_110 = arith.constant 143 : index
    %446 = vector.load %arg8[%c2_108, %c0_109, %c143_110] : memref<3x1x512xf32, #tpu.memory_space<vmem>>, vector<1x1x256xf32>
    %447 = vector.shape_cast %446 : vector<1x1x256xf32> to vector<1x256xf32>
    %448 = vector.broadcast %2 : f32 to vector<1x256xf32>
    %449 = arith.select %144, %448, %447 : vector<1x256xi1>, vector<1x256xf32>
    %450 = vector.broadcast %66 : f32 to vector<1x256xf32>
    %451 = arith.mulf %450, %449 : vector<1x256xf32>
    %452 = arith.addf %439, %451 : vector<1x256xf32>
    %453 = vector.broadcast %67 : f32 to vector<1x256xf32>
    %454 = arith.mulf %453, %449 : vector<1x256xf32>
    %455 = arith.addf %442, %454 : vector<1x256xf32>
    %456 = vector.broadcast %68 : f32 to vector<1x256xf32>
    %457 = arith.mulf %456, %449 : vector<1x256xf32>
    %458 = arith.addf %445, %457 : vector<1x256xf32>
    %c2_111 = arith.constant 2 : index
    %c0_112 = arith.constant 0 : index
    %c144_113 = arith.constant 144 : index
    %459 = vector.load %arg8[%c2_111, %c0_112, %c144_113] : memref<3x1x512xf32, #tpu.memory_space<vmem>>, vector<1x1x256xf32>
    %460 = vector.shape_cast %459 : vector<1x1x256xf32> to vector<1x256xf32>
    %461 = vector.broadcast %75 : f32 to vector<1x256xf32>
    %462 = arith.mulf %461, %460 : vector<1x256xf32>
    %463 = arith.addf %452, %462 : vector<1x256xf32>
    %464 = vector.broadcast %76 : f32 to vector<1x256xf32>
    %465 = arith.mulf %464, %460 : vector<1x256xf32>
    %466 = arith.addf %455, %465 : vector<1x256xf32>
    %467 = vector.broadcast %77 : f32 to vector<1x256xf32>
    %468 = arith.mulf %467, %460 : vector<1x256xf32>
    %469 = arith.addf %458, %468 : vector<1x256xf32>
    %c2_114 = arith.constant 2 : index
    %c0_115 = arith.constant 0 : index
    %c145_116 = arith.constant 145 : index
    %470 = vector.load %arg8[%c2_114, %c0_115, %c145_116] : memref<3x1x512xf32, #tpu.memory_space<vmem>>, vector<1x1x256xf32>
    %471 = vector.shape_cast %470 : vector<1x1x256xf32> to vector<1x256xf32>
    %472 = vector.broadcast %2 : f32 to vector<1x256xf32>
    %473 = arith.select %146, %472, %471 : vector<1x256xi1>, vector<1x256xf32>
    %474 = vector.broadcast %84 : f32 to vector<1x256xf32>
    %475 = arith.mulf %474, %473 : vector<1x256xf32>
    %476 = arith.addf %463, %475 : vector<1x256xf32>
    %477 = vector.broadcast %85 : f32 to vector<1x256xf32>
    %478 = arith.mulf %477, %473 : vector<1x256xf32>
    %479 = arith.addf %466, %478 : vector<1x256xf32>
    %480 = vector.broadcast %86 : f32 to vector<1x256xf32>
    %481 = arith.mulf %480, %473 : vector<1x256xf32>
    %482 = arith.addf %469, %481 : vector<1x256xf32>
    %cst = arith.constant 0.000000e+00 : f32
    %483 = vector.broadcast %cst : f32 to vector<1x8xf32>
    %c0_117 = arith.constant 0 : index
    %c0_118 = arith.constant 0 : index
    %484 = vector.load %arg6[%c0_117, %c0_118] : memref<1x8xf32, #tpu.memory_space<vmem>>, vector<1x8xf32>
    %485 = arith.addf %483, %484 : vector<1x8xf32>
    %cst_119 = arith.constant 0.000000e+00 : f32
    %cst_120 = arith.constant 1.000000e+00 : f32
    %486 = vector.broadcast %cst_119 : f32 to vector<1x256xf32>
    %487 = arith.maximumf %486, %476 : vector<1x256xf32>
    %488 = vector.broadcast %cst_120 : f32 to vector<1x256xf32>
    %489 = arith.minimumf %488, %487 : vector<1x256xf32>
    %cst_121 = arith.constant dense<0.000000e+00> : vector<1xf32>
    %490 = vector.multi_reduction <add>, %489, %cst_121 [1] : vector<1x256xf32> to vector<1xf32>
    %491 = vector.shape_cast %490 : vector<1xf32> to vector<1x1xf32>
    %cst_122 = arith.constant 3.906250e-03 : f32
    %492 = vector.broadcast %cst_122 : f32 to vector<1x1xf32>
    %493 = arith.mulf %491, %492 : vector<1x1xf32>
    %c0_123 = arith.constant 0 : index
    %c0_124 = arith.constant 0 : index
    %494 = vector.load %arg5[%c0_123, %c0_124] : memref<3x8xf32, #tpu.memory_space<vmem>>, vector<1x8xf32>
    %495 = vector.broadcast %493 : vector<1x1xf32> to vector<1x8xf32>
    %496 = arith.mulf %495, %494 : vector<1x8xf32>
    %497 = arith.addf %485, %496 : vector<1x8xf32>
    %cst_125 = arith.constant 0.000000e+00 : f32
    %cst_126 = arith.constant 1.000000e+00 : f32
    %498 = vector.broadcast %cst_125 : f32 to vector<1x256xf32>
    %499 = arith.maximumf %498, %479 : vector<1x256xf32>
    %500 = vector.broadcast %cst_126 : f32 to vector<1x256xf32>
    %501 = arith.minimumf %500, %499 : vector<1x256xf32>
    %cst_127 = arith.constant dense<0.000000e+00> : vector<1xf32>
    %502 = vector.multi_reduction <add>, %501, %cst_127 [1] : vector<1x256xf32> to vector<1xf32>
    %503 = vector.shape_cast %502 : vector<1xf32> to vector<1x1xf32>
    %cst_128 = arith.constant 3.906250e-03 : f32
    %504 = vector.broadcast %cst_128 : f32 to vector<1x1xf32>
    %505 = arith.mulf %503, %504 : vector<1x1xf32>
    %c1_129 = arith.constant 1 : index
    %c0_130 = arith.constant 0 : index
    %506 = vector.load %arg5[%c1_129, %c0_130] : memref<3x8xf32, #tpu.memory_space<vmem>>, vector<1x8xf32>
    %507 = vector.broadcast %505 : vector<1x1xf32> to vector<1x8xf32>
    %508 = arith.mulf %507, %506 : vector<1x8xf32>
    %509 = arith.addf %497, %508 : vector<1x8xf32>
    %cst_131 = arith.constant 0.000000e+00 : f32
    %cst_132 = arith.constant 1.000000e+00 : f32
    %510 = vector.broadcast %cst_131 : f32 to vector<1x256xf32>
    %511 = arith.maximumf %510, %482 : vector<1x256xf32>
    %512 = vector.broadcast %cst_132 : f32 to vector<1x256xf32>
    %513 = arith.minimumf %512, %511 : vector<1x256xf32>
    %cst_133 = arith.constant dense<0.000000e+00> : vector<1xf32>
    %514 = vector.multi_reduction <add>, %513, %cst_133 [1] : vector<1x256xf32> to vector<1xf32>
    %515 = vector.shape_cast %514 : vector<1xf32> to vector<1x1xf32>
    %cst_134 = arith.constant 3.906250e-03 : f32
    %516 = vector.broadcast %cst_134 : f32 to vector<1x1xf32>
    %517 = arith.mulf %515, %516 : vector<1x1xf32>
    %c2_135 = arith.constant 2 : index
    %c0_136 = arith.constant 0 : index
    %518 = vector.load %arg5[%c2_135, %c0_136] : memref<3x8xf32, #tpu.memory_space<vmem>>, vector<1x8xf32>
    %519 = vector.broadcast %517 : vector<1x1xf32> to vector<1x8xf32>
    %520 = arith.mulf %519, %518 : vector<1x8xf32>
    %521 = arith.addf %509, %520 : vector<1x8xf32>
    %c0_137 = arith.constant 0 : index
    %c0_138 = arith.constant 0 : index
    %c0_139 = arith.constant 0 : index
    %522 = vector.load %arg7[%c0_137, %c0_138, %c0_139] : memref<1x1x8xf32, #tpu.memory_space<vmem>>, vector<1x1x8xf32>
    %523 = vector.shape_cast %522 : vector<1x1x8xf32> to vector<1x8xf32>
    %524 = vector.shape_cast %521 : vector<1x8xf32> to vector<1x1x8xf32>
    tpu.vector_store %arg7[%c0_137, %c0_138, %c0_139], %524 {strides = array<i32>} : memref<1x1x8xf32, #tpu.memory_space<vmem>>, vector<1x1x8xf32>,
    return
  }
  func.func @transform_0(%arg0: i32) -> (i32, i32, i32) {
    %c0_i32 = arith.constant 0 : i32
    %c0_i32_0 = arith.constant 0 : i32
    %c0_i32_1 = arith.constant 0 : i32
    return %arg0, %c0_i32, %c0_i32_0 : i32, i32, i32
  }
  func.func @transform_1(%arg0: i32) -> i32 {
    %c0_i32 = arith.constant 0 : i32
    %c0_i32_0 = arith.constant 0 : i32
    return %c0_i32 : i32
  }
  func.func @transform_2(%arg0: i32) -> i32 {
    %c0_i32 = arith.constant 0 : i32
    %c0_i32_0 = arith.constant 0 : i32
    return %c0_i32 : i32
  }
  func.func @transform_3(%arg0: i32) -> i32 {
    %c0_i32 = arith.constant 0 : i32
    %c0_i32_0 = arith.constant 0 : i32
    return %c0_i32 : i32
  }
  func.func @transform_4(%arg0: i32) -> (i32, i32) {
    %c0_i32 = arith.constant 0 : i32
    %c0_i32_0 = arith.constant 0 : i32
    %c0_i32_1 = arith.constant 0 : i32
    return %c0_i32, %c0_i32_0 : i32, i32
  }
  func.func @transform_5(%arg0: i32) -> (i32, i32) {
    %c0_i32 = arith.constant 0 : i32
    %c0_i32_0 = arith.constant 0 : i32
    %c0_i32_1 = arith.constant 0 : i32
    return %c0_i32, %c0_i32_0 : i32, i32
  }
  func.func @transform_6(%arg0: i32) -> (i32, i32, i32) {
    %c0_i32 = arith.constant 0 : i32
    %c0_i32_0 = arith.constant 0 : i32
    %c0_i32_1 = arith.constant 0 : i32
    return %arg0, %c0_i32, %c0_i32_0 : i32, i32, i32
  }
}

</mosaic_0001>

<bundles_post_ra>
// kernel: tpu_custom_call.1
= control target key start
LH: loop header
LB: loop body
LE: loop exit
PB: predicated region body
PF: predicated region fallthrough
CT: control target
= control target key end

     0   :  { %11 = vsyncpa [#allocation5], 0  ;;  %s2883_s0 = inlined_call_operand.vmem [shape: f32[2,3,256], index: 0, kind: input, shape index: {}]   ;;  %s2884_s1 = inlined_call_operand.vmem [shape: f32[81], index: 1, kind: input, shape index: {}]   ;;  %s2885_s2 = inlined_call_operand.vmem [shape: f32[3], index: 2, kind: input, shape index: {}]   ;;  %s2886_s3 = inlined_call_operand.vmem [shape: f32[3], index: 3, kind: input, shape index: {}]   ;;  %s2887_s4 = inlined_call_operand.vmem [shape: f32[3,8], index: 4, kind: input, shape index: {}]   ;;  %s2888_s5 = inlined_call_operand.vmem [shape: f32[1,8], index: 5, kind: input, shape index: {}]   ;;  %s2889_s6 = inlined_call_operand.hbm [shape: f32[2,1,8], index: 6, kind: output, shape index: {}]  }
   0x1   :  { %12 = vsyncpa [#allocation7], 0 }
   0x2   :  { %13 = vsyncpa [#allocation4], 0 }
   0x3   :  { %15 = vsyncpa [#allocation4 + $0x1], 0  ;;  %s1851_s21 = smov 0   ;;  %s1853_s22 = smov 0  }
   0x4   :  { %s1855_s23 = smov 0   ;;  %s1857_s24 = smov 0  }
   0x5 LB: > { %s1872_s25 = sadd.s32 4294967295, %s1803_s24   ;;  %s1509_s26 = sadd.s32 4294967294, %s1803_s24   ;;  %s1803_s24 = sphi %s1857_s24, %s2929_s24   ;;  %s1799_s23 = sphi %s1855_s23, %s2928_s23   ;;  %s1795_s22 = sphi %s1853_s22, %s2927_s22   ;;  %s1791_s21 = sphi %s1851_s21, %s2926_s21  }
   0x6   : > { %s1876_s27 = sadd.s32 1, %s1803_s24   ;;  %s159_s28 = sadd.s32 1, %s1799_s23 }
   0x7   : > { %s156_s29 = ssub.s32 %s1803_s24, %s1876_s27  ;;  %p169_p0 = scmp.ne.s32.totalorder %s1799_s23, %s1795_s22 }
   0x8   : > { %p157_p1 = scmp.eq.s32.totalorder %s156_s29, 0  ;;  %p170_p2 = scmp.eq.s32.totalorder %s1872_s25, 1 }
   0x9   : > { %p175_p3 = scmp.ne.s32.totalorder %s1795_s22, %s1791_s21  ;;  %p176_p4 = scmp.eq.s32.totalorder %s1509_s26, 1 }
   0xa   : > { %s1887_s30 = scalar_select %p157_p1, %s1799_s23, %s159_s28  }
   0xb   : > { %p1889_p5 = por %p170_p2, %p169_p0  ;;  %p1893_p6 = por %p176_p4, %p175_p3 }
   0xc   : > { %p1510_p7 = scmp.ge.s32.totalorder %s1803_s24, 1  ;;  %p183_p8 = scmp.lt.s32.totalorder %s1803_s24, 3 }
   0xd   : > { %p1638_p9 = scmp.eq.s32.totalorder %s1872_s25, 0  ;;  %s205_s12 = sshll.u32 %s2885_s2, 4  ;;  %s206_s12 = int_to_ptr.vmem [resolvable:$true] %s205_s12 }
   0xe   : > { %p1900_p10 = pnand %p1510_p7, %p183_p8  ;;  %s195_s15 = sshll.u32 %s2884_s1, 4  ;;  %s196_s15 = int_to_ptr.vmem [resolvable:$true] %s195_s15 }
   0xf   : > { %s215_s18 = sshll.u32 %s2886_s3, 4  ;;  %s1805_s19 = smov [#allocation6]   ;;  %s216_s18 = int_to_ptr.vmem [resolvable:$true] %s215_s18 }
  0x10   : > { %p1624_p11 = pneg %p1900_p10  ;;  %s1806_s20 = smov [#allocation3]  }
  0x11   : > { %s1807_s26 = smov [#allocation8]  }
  0x12   : > { %p1625_p12 = pnand %p1638_p9, %p1624_p11  ;;  %242 = sbr.rel (%p1900_p10) target bundleno = 578 (0x242), region = 44 }
  0x14   : > { %1630 = dma.vmem_to_smem (!%p1625_p12), %s206_s12, 16, %s1805_s19, [#allocation7]  }
  0x15   : > { %1627 = dma.vmem_to_smem (!%p1625_p12), %s196_s15, 16, %s1806_s20, [#allocation5]  }
  0x16   : > { %1633 = dma.vmem_to_smem (!%p1625_p12), %s216_s18, 16, %s1807_s26, [#allocation7]  }
  0x17   : > { %1778 = dma.done.wait (%p1638_p9), [#allocation5], 16  }
  0x18   : > { %1780 = vsyncadd (%p1638_p9), [#allocation5], 4294967280 }
  0x19   : > { %1782 = dma.done.wait (%p1638_p9), [#allocation7], 32  }
  0x1a   : > { %1784 = vsyncadd (%p1638_p9), [#allocation7], 4294967264 }
  0x1b   : > { %259 = sfence }
  0x1c   : > { %p283_p13 = scmp.lt.s32.totalorder %s1872_s25, 1  ;;  %s288_s28 = sld [smem:[#allocation8]]  ;;  %v376_v0 = vlaneseq  ;;  %vm479_vm2 = vcmask 130048   ;;  %vm445_vm3 = vcmask 138240   ;;  %vm528_vm6 = vcmask 121856  }
  0x1d   : > { %s1533_s13 = sld [smem:[#allocation3 + $0x9]]  ;;  %s2896_s15 = smov 17   ;;  %vm556_vm9 = vcmask 7168   ;;  %vm617_vm10 = vcmask 1039360   ;;  %vm645_vm11 = vcmask 924672   ;;  %vm679_vm12 = vcmask 916480  }
  0x1e   : > { %s284_s29 = scalar_select %p283_p13, %s1872_s25, 1  ;;  %vm1930_vm0 = vcmp.lt.s32.totalorder %v376_v0, 128  ;;  %vm1940_vm1 = vcmp.lt.s32.totalorder %v376_v0, 256  ;;  %v2019_v63 = vand.u32 127, %v376_v0  ;;  %vm728_vm13 = vcmask 908288  }
  0x1f   : > { %s1534_s14 = sld [smem:[#allocation3 + $0xa]]  ;;  %s2894_s16 = smov 16   ;;  %vm1372_vm14 = vcmask 1040384   ;;  %vm1408_vm15 = vcmask 57344  }
  0x20   : > { %s1609_s9 = sshll.u32 %s284_s29, 3  ;;  %s1535_s17 = sld [smem:[#allocation3 + $0xb]] }
  0x21   : > { %s1937_s12 = scalar_lea.vmem %s2883_s0, %s1609_s9  ;;  %s2892_s18 = smov 15  }
  0x22   : > { %v1944_v3 = vstv %s288_s28  ;;  %v382_v4 = vld [vmem:[%s1937_s12] ss:$4 sm:$0x3]  ;;  %s2890_s19 = smov 1   ;;  %s1587_s20 = sld [smem:[#allocation3 + $0x3f]] }
  0x23   : > { %380 = vst.msk [vmem:[#allocation2] sm:$0x1] %vm1930_vm0, %v1944_v3  ;;  %v467_v5 = vstv %s1533_s13  ;;  %s1521_s26 = sld [smem:[#allocation8 + $0x1]]  ;;  %s1812_s28 = smov 127  }
  0x24   : > { %385 = vst.msk [vmem:[#allocation2 + $0x1] sm:$0x3] %vm1940_vm1, %v382_v4  ;;  %s1588_s29 = sld [smem:[#allocation3 + $0x40]]  ;;  %v1605_v30 = vld [vmem:[%s1937_s12 + $0x1] ss:$4 sm:$0x3] }
  0x25   : > { %381 = vst.msk [vmem:[#allocation2 + $0x3] sm:$0x1] %vm1930_vm0, %v1944_v3  ;;  %v486_v13 = vstv %s1534_s14  ;;  %s2902_s9 = smov 113   ;;  %s1589_s10 = sld [smem:[#allocation3 + $0x41]] }
  0x26   : > { %v504_v18 = vstv %s1535_s17  ;;  %392 = vst.msk [vmem:[#allocation2 + $0x5] sm:$0x3] %vm1940_vm1, %v1605_v30  ;;  %s2900_s11 = smov 112   ;;  %s1536_s13 = sld [smem:[#allocation3 + $0xc]] }
  0x27   : > { %s2898_s14 = smov 111   ;;  %s1537_s17 = sld [smem:[#allocation3 + $0xd]] }
  0x28   : > { %v667_v28 = vstv %s1587_s20  ;;  %s1538_s20 = sld [smem:[#allocation3 + $0xe]] }
  0x29   : > { %v1976_v29 = vstv %s1521_s26  ;;  %s294_s26 = sld [smem:[#allocation3]] }
  0x2a   : > { %388 = vst.msk [vmem:[#allocation2 + $0x4] sm:$0x1] %vm1930_vm0, %v1976_v29  ;;  %v686_v34 = vstv %s1588_s29  ;;  %s1525_s29 = sld [smem:[#allocation3 + $0x1]] }
  0x2b   : > { %v434_v6 = vld [vmem:[#allocation2] sm:$0x7]  ;;  %389 = vst.msk [vmem:[#allocation2 + $0x7] sm:$0x1] %vm1930_vm0, %v1976_v29  ;;  %v704_v39 = vstv %s1589_s10  ;;  %s291_s10 = sld [smem:[#allocation6]] }
  0x2c   : > { %v438_v7 = vperm.slane %v434_v6, 2  ;;  %v436_v8 = vperm.slane %v434_v6, 0  ;;  %v468_v9 = vmul.f32 %v467_v5, %v434_v6  ;;  %v437_v12 = vperm.slane %v434_v6, 1  ;;  %v606_v24 = vld [vmem:[#allocation2 + $0x1] sm:$0x7] }
  0x2d   : > { %v487_v15 = vmul.f32 %v486_v13, %v434_v6  ;;  %v505_v20 = vmul.f32 %v504_v18, %v434_v6  ;;  %v609_v25 = vperm.slane %v606_v24, 1  ;;  %v608_v26 = vperm.slane %v606_v24, 0 }
  0x2e   : > { %443 = vrot.lane.b32.xlu1 %v438_v7, %s2896_s15  ;;  %439 = vrot.lane.b32.xlu0 %v436_v8, %s2896_s15  ;;  %v471_v10 = vperm.slane %v468_v9, 1  ;;  %v470_v11 = vperm.slane %v468_v9, 0  ;;  %v472_v14 = vperm.slane %v468_v9, 2  ;;  %v610_v27 = vperm.slane %v606_v24, 2 }
  0x2f   : > { %v490_v16 = vperm.slane %v487_v15, 1  ;;  %v489_v17 = vperm.slane %v487_v15, 0  ;;  %v491_v19 = vperm.slane %v487_v15, 2  ;;  %v508_v21 = vperm.slane %v505_v20, 1 }
  0x30   : > { %475 = vrot.lane.b32.xlu2 %v471_v10, %s2894_s16  ;;  %v507_v22 = vperm.slane %v505_v20, 0  ;;  %v509_v23 = vperm.slane %v505_v20, 2  ;;  %v668_v31 = vmul.f32 %v667_v28, %v606_v24  ;;  %v687_v36 = vmul.f32 %v686_v34, %v606_v24 }
  0x31   : > { %v705_v41 = vmul.f32 %v704_v39, %v606_v24  ;;  %v750_v45 = vld [vmem:[#allocation2 + $0x4] sm:$0x7]  ;;  %v782_v49 = vstv %s1536_s13  ;;  %v800_v55 = vstv %s1537_s17  ;;  %v818_v62 = vstv %s1538_s20  ;;  %s2031_s13 = sld [smem:[#allocation6 + $0x1]] }
  0x32   : > { %v671_v32 = vperm.slane %v668_v31, 1  ;;  %v670_v33 = vperm.slane %v668_v31, 0  ;;  %v672_v35 = vperm.slane %v668_v31, 2  ;;  %v690_v37 = vperm.slane %v687_v36, 1  ;;  %s2049_s17 = sld [smem:[#allocation3 + $0x2]] }
  0x33   : > { %v689_v38 = vperm.slane %v687_v36, 0  ;;  %v691_v40 = vperm.slane %v687_v36, 2  ;;  %v708_v42 = vperm.slane %v705_v41, 1  ;;  %v707_v43 = vperm.slane %v705_v41, 0  ;;  %s1524_s20 = sld [smem:[#allocation6 + $0x2]] }
  0x34   : > { %v709_v44 = vperm.slane %v705_v41, 2  ;;  %v2002_v46 = vperm.slane %v750_v45, 1  ;;  %v2004_v47 = vperm.slane %v750_v45, 0  ;;  %v2006_v50 = vperm.slane %v750_v45, 2 }
  0x35   : > { %v783_v51 = vmul.f32 %v782_v49, %v750_v45  ;;  %v801_v58 = vmul.f32 %v800_v55, %v750_v45  ;;  %v819_v5 = vmul.f32 %v818_v62, %v750_v45  ;;  %v2024_v6 = vadd.s32 128, %v2019_v63 }
  0x36   : > { %473 = vrot.lane.b32.xlu1 %v470_v11, %s2894_s16  ;;  %441 = vrot.lane.b32.xlu0 %v437_v12, %s2896_s15  ;;  %v407_v11 = vand.u32 15, %v2019_v63  ;;  %v457_v20 = vstv %s1525_s29  ;;  %s2083_s29 = sld [smem:[#allocation3 + $0x13]] }
  0x37   : > { %v786_v52 = vperm.slane %v783_v51, 1  ;;  %v785_v53 = vperm.slane %v783_v51, 0  ;;  %v787_v57 = vperm.slane %v783_v51, 2  ;;  %v804_v59 = vperm.slane %v801_v58, 1 }
  0x38   : > { %477 = vrot.lane.b32.xlu2 %v472_v14, %s2894_s16  ;;  %v803_v60 = vperm.slane %v801_v58, 0  ;;  %v805_v4 = vperm.slane %v801_v58, 2  ;;  %v822_v9 = vperm.slane %v819_v5, 1  ;;  %v821_v10 = vperm.slane %v819_v5, 0 }
  0x39   : > { %v823_v13 = vperm.slane %v819_v5, 2  ;;  %vm2037_vm4 = vcmp.eq.s32.totalorder %v407_v11, 0  ;;  %v432_v34 = vstv %s2031_s13  ;;  %v462_v41 = vstv %s2049_s17  ;;  %s2093_s13 = sld [smem:[#allocation3 + $0x42]] }
  0x3a   : > { %s2097_s17 = sld [smem:[#allocation3 + $0x1b]]  ;;  %vm2137_vm8 = vcmp.eq.s32.totalorder %v407_v11, 15  ;;  %v578_v11 = vld [vmem:[#allocation2 + $0x1] sm:$0x3] }
  0x3e   : > { %494 = vrot.lane.b32.xlu1 %v490_v16, %s2894_s16  ;;  %492 = vrot.lane.b32.xlu0 %v489_v17, %s2894_s16  ;;  %v452_v17 = vstv %s294_s26  ;;  %s2081_s26 = sld [smem:[#allocation3 + $0x12]] }
  0x40   : > { %496 = vrot.lane.b32.xlu2 %v491_v19, %s2894_s16 }
  0x46   : > { %512 = vrot.lane.b32.xlu1 %v508_v21, %s2894_s16  ;;  %510 = vrot.lane.b32.xlu0 %v507_v22, %s2894_s16 }
  0x48   : > { %514 = vrot.lane.b32.xlu2 %v509_v23, %s2894_s16  ;;  %v431_v23 = vstv %s291_s10  ;;  %s2089_s10 = sld [smem:[#allocation3 + $0x14]] }
  0x4e   : > { %524 = vrot.lane.b32.xlu1 %v437_v12, %s2892_s18  ;;  %522 = vrot.lane.b32.xlu0 %v436_v8, %s2892_s18 }
  0x50   : > { %526 = vrot.lane.b32.xlu2 %v438_v7, %s2892_s18 }
  0x56   : > { %552 = vrot.lane.b32.xlu1 %v437_v12, %s2890_s19  ;;  %550 = vrot.lane.b32.xlu0 %v436_v8, %s2890_s19  ;;  %v414_v12 = vand.u32 15, %v2024_v6 }
  0x58   : > { %554 = vrot.lane.b32.xlu2 %v438_v7, %s2890_s19  ;;  %vm2043_vm5 = vcmp.eq.s32.totalorder %v414_v12, 0  ;;  %vm2131_vm7 = vcmp.eq.s32.totalorder %v414_v12, 15 }
  0x5e   : > { %613 = vrot.lane.b32.xlu1 %v609_v25, %s1812_s28  ;;  %611 = vrot.lane.b32.xlu0 %v608_v26, %s1812_s28 }
  0x60   : > { %615 = vrot.lane.b32.xlu2 %v610_v27, %s1812_s28 }
  0x66   : > { %641 = vrot.lane.b32.xlu1 %v609_v25, %s2902_s9  ;;  %639 = vrot.lane.b32.xlu0 %v608_v26, %s2902_s9 }
  0x68   : > { %643 = vrot.lane.b32.xlu2 %v610_v27, %s2902_s9  ;;  %s2149_s9 = sld [smem:[#allocation3 + $0x2d]] }
  0x6e   : > { %675 = vrot.lane.b32.xlu1 %v671_v32, %s2900_s11  ;;  %673 = vrot.lane.b32.xlu0 %v670_v33, %s2900_s11 }
  0x70   : > { %677 = vrot.lane.b32.xlu2 %v672_v35, %s2900_s11 }
  0x76   : > { %694 = vrot.lane.b32.xlu1 %v690_v37, %s2900_s11  ;;  %692 = vrot.lane.b32.xlu0 %v689_v38, %s2900_s11 }
  0x78   : > { %696 = vrot.lane.b32.xlu2 %v691_v40, %s2900_s11 }
  0x7e   : > { %712 = vrot.lane.b32.xlu1 %v708_v42, %s2900_s11  ;;  %710 = vrot.lane.b32.xlu0 %v707_v43, %s2900_s11 }
  0x80   : > { %714 = vrot.lane.b32.xlu2 %v709_v44, %s2900_s11  ;;  %s2142_s11 = sld [smem:[#allocation3 + $0x26]] }
  0x86   : > { %724 = vrot.lane.b32.xlu1 %v609_v25, %s2898_s14  ;;  %722 = vrot.lane.b32.xlu0 %v608_v26, %s2898_s14 }
  0x88   : > { %726 = vrot.lane.b32.xlu2 %v610_v27, %s2898_s14  ;;  %s2127_s14 = sld [smem:[#allocation3 + $0x43]] }
  0x8a   : > { %v476_v48 = vpop.permute.xlu2 %475 }
  0x8e   : > { %757 = vrot.lane.b32.xlu1 %v2002_v46, %s2896_s15  ;;  %755 = vrot.lane.b32.xlu0 %v2004_v47, %s2896_s15 }
  0x90   : > { %759 = vrot.lane.b32.xlu2 %v2006_v50, %s2896_s15  ;;  %s2121_s15 = sld [smem:[#allocation3 + $0x25]] }
  0x92   : > { %v478_v54 = vpop.permute.xlu2 %477 }
  0x93   : > { %v481_v56 = vsel %vm479_vm2, %v476_v48, %v478_v54 }
  0x96   : > { %790 = vrot.lane.b32.xlu1 %v786_v52, %s2894_s16  ;;  %788 = vrot.lane.b32.xlu0 %v785_v53, %s2894_s16  ;;  %v433_v52 = vstv %s1524_s20  ;;  %v2091_v53 = vld [vmem:[#allocation2 + $0x5] sm:$0x7]  ;;  %s2102_s20 = sld [smem:[#allocation3 + $0x24]] }
  0x97   : > { %v2117_v62 = vperm.slane %v2091_v53, 2 }
  0x98   : > { %792 = vrot.lane.b32.xlu2 %v787_v57, %s2894_s16 }
  0x9a   : > { %v497_v61 = vpop.permute.xlu2 %496 }
  0x9c   : > { %v579_v12 = vstv %s2102_s20  ;;  %s2299_s20 = sld [smem:[#allocation3 + $0x4a]] }
  0x9e   : > { %808 = vrot.lane.b32.xlu1 %v804_v59, %s2894_s16  ;;  %806 = vrot.lane.b32.xlu0 %v803_v60, %s2894_s16  ;;  %v2105_v60 = vperm.slane %v2091_v53, 1 }
  0xa0   : > { %v444_v7 = vpop.permute.xlu1 %443  ;;  %v440_v8 = vpop.permute.xlu0 %439  ;;  %810 = vrot.lane.b32.xlu2 %v805_v4, %s2894_s16 }
  0xa2   : > { %v2027_v0 = vpop.permute.xlu2 %514 }
  0xa6   : > { %826 = vrot.lane.b32.xlu1 %v822_v9, %s2894_s16  ;;  %824 = vrot.lane.b32.xlu0 %v821_v10, %s2894_s16  ;;  %v540_v9 = vstv %s2083_s29  ;;  %v545_v10 = vstv %s2089_s10  ;;  %s2921_s29 = smov 111   ;;  %s2922_s10 = smov 17  }
  0xa8   : > { %v474_v16 = vpop.permute.xlu1 %473  ;;  %v442_v18 = vpop.permute.xlu0 %441  ;;  %828 = vrot.lane.b32.xlu2 %v823_v13, %s2894_s16  ;;  %s2119_s16 = sld [smem:[#allocation8 + $0x2]] }
  0xa9   : > { %v480_v19 = vsel %vm479_vm2, %v474_v16, %v476_v48  ;;  %v446_v21 = vsel %vm445_vm3, %v440_v8, %v442_v18  ;;  %v447_v22 = vsel %vm445_vm3, %v442_v18, %v444_v7  ;;  %v977_v7 = vstv %s2093_s13  ;;  %s2295_s13 = sld [smem:[#allocation3 + $0x48]] }
  0xaa   : > { %v450_v24 = vsel %vm2037_vm4, %v1944_v3, %v446_v21  ;;  %v451_v25 = vsel %vm2043_vm5, %v1944_v3, %v447_v22  ;;  %v2059_v26 = vpop.permute.xlu2 %526  ;;  %v535_v8 = vstv %s2081_s26  ;;  %v2162_v18 = vmul.f32 %v977_v7, %v2091_v53  ;;  %s2191_s26 = sld [smem:[#allocation3 + $0x2f]] }
  0xab   : > { %v453_v27 = vmul.f32 %v452_v17, %v450_v24  ;;  %v454_v28 = vmul.f32 %v452_v17, %v451_v25  ;;  %v458_v30 = vmul.f32 %v457_v20, %v450_v24  ;;  %v459_v31 = vmul.f32 %v457_v20, %v451_v25 }
  0xac   : > { %v463_v49 = vmul.f32 %v462_v41, %v450_v24  ;;  %v464_v51 = vmul.f32 %v462_v41, %v451_v25  ;;  %v597_v41 = vstv %s2142_s11  ;;  %s2232_s11 = sld [smem:[#allocation3 + $0x38]] }
  0xad   : > { %v455_v32 = vadd.f32 %v453_v27, %v431_v23  ;;  %v456_v33 = vadd.f32 %v454_v28, %v431_v23  ;;  %v461_v38 = vadd.f32 %v459_v31, %v432_v34  ;;  %v460_v39 = vadd.f32 %v458_v30, %v432_v34  ;;  %v1606_v28 = vld [vmem:[%s1937_s12 + $0x2] ss:$4 sm:$0x3]  ;;  %s2184_s12 = sld [smem:[#allocation3 + $0x2e]] }
  0xae   : > { %838 = vrot.lane.b32.xlu1 %v2002_v46, %s2892_s18  ;;  %836 = vrot.lane.b32.xlu0 %v2004_v47, %s2892_s18  ;;  %v466_v55 = vadd.f32 %v464_v51, %v433_v52  ;;  %v2169_v27 = vstv %s2119_s16  ;;  %s2919_s16 = smov 113   ;;  %399 = vst.msk [vmem:[#allocation2 + $0x9] sm:$0x3] %vm1940_vm1, %v1606_v28 }
  0xaf   : > { %v2066_v35 = vadd.f32 %v481_v56, %v456_v33  ;;  %v2068_v36 = vadd.f32 %v480_v19, %v455_v32  ;;  %v465_v56 = vadd.f32 %v463_v49, %v433_v52  ;;  %395 = vst.msk [vmem:[#allocation2 + $0x8] sm:$0x1] %vm1930_vm0, %v2169_v27  ;;  %v624_v49 = vstv %s2149_s9  ;;  %s2230_s9 = sld [smem:[#allocation3 + $0x37]] }
  0xb0   : > { %v495_v37 = vpop.permute.xlu1 %494  ;;  %v493_v40 = vpop.permute.xlu0 %492  ;;  %840 = vrot.lane.b32.xlu2 %v2006_v50, %s2892_s18  ;;  %s2114_s18 = sld [smem:[#allocation3 + $0x1d]]  ;;  %396 = vst.msk [vmem:[#allocation2 + $0xb] sm:$0x1] %vm1930_vm0, %v2169_v27 }
  0xb1   : > { %v499_v42 = vsel %vm479_vm2, %v495_v37, %v497_v61  ;;  %v498_v43 = vsel %vm479_vm2, %v493_v40, %v495_v37  ;;  %v2108_v61 = vperm.slane %v2091_v53, 0  ;;  %v588_v40 = vstv %s2121_s15  ;;  %s2920_s15 = smov 112  }
  0xb2   : > { %v2075_v44 = vadd.f32 %v499_v42, %v461_v38  ;;  %v2077_v45 = vadd.f32 %v498_v43, %v460_v39  ;;  %v2079_v48 = vpop.permute.xlu2 %554  ;;  %v995_v38 = vstv %s2127_s14  ;;  %s1539_s14 = sld [smem:[#allocation3 + $0xf]] }
  0xb3   : > { %v2209_v51 = vmul.f32 %v995_v38, %v2091_v53 }
  0xb6   : > { %865 = vrot.lane.b32.xlu1 %v2002_v46, %s2890_s19  ;;  %863 = vrot.lane.b32.xlu0 %v2004_v47, %s2890_s19  ;;  %v573_v39 = vstv %s2114_s18  ;;  %s2203_s18 = sld [smem:[#allocation3 + $0x44]] }
  0xb8   : > { %v513_v54 = vpop.permute.xlu1 %512  ;;  %v511_v57 = vpop.permute.xlu0 %510  ;;  %867 = vrot.lane.b32.xlu2 %v2006_v50, %s2890_s19  ;;  %s2112_s19 = sld [smem:[#allocation3 + $0x1c]] }
  0xb9   : > { %v517_v46 = vsel %vm479_vm2, %v513_v54, %v2027_v0  ;;  %v516_v47 = vsel %vm479_vm2, %v511_v57, %v513_v54  ;;  %v589_v57 = vmul.f32 %v588_v40, %v578_v11 }
  0xba   : > { %v521_v58 = vadd.f32 %v517_v46, %v466_v55  ;;  %v520_v59 = vadd.f32 %v516_v47, %v465_v56  ;;  %v2110_v50 = vpop.permute.xlu2 %615  ;;  %v598_v46 = vmul.f32 %v597_v41, %v578_v11 }
  0xbb   : > { %v591_v28 = vperm.slane %v589_v57, 0 }
  0xbe   : > { %925 = vrot.lane.b32.xlu1 %v2105_v60, %s1812_s28  ;;  %923 = vrot.lane.b32.xlu0 %v2108_v61, %s1812_s28 }
  0xc0   : > { %v525_v0 = vpop.permute.xlu1 %524  ;;  %v523_v13 = vpop.permute.xlu0 %522  ;;  %927 = vrot.lane.b32.xlu2 %v2117_v62, %s1812_s28 }
  0xc1   : > { %v530_v63 = vsel %vm528_vm6, %v525_v0, %v2059_v26  ;;  %v529_v6 = vsel %vm528_vm6, %v523_v13, %v525_v0  ;;  %v2166_v26 = vmul.f32 %v579_v12, %v578_v11  ;;  %v592_v11 = vperm.slane %v589_v57, 1 }
  0xc2   : > { %v534_v16 = vsel %vm2131_vm7, %v1944_v3, %v530_v63  ;;  %v533_v17 = vsel %vm2137_vm8, %v1944_v3, %v529_v6  ;;  %v2164_v19 = vpop.permute.xlu2 %643 }
  0xc3   : > { %v537_v20 = vmul.f32 %v535_v8, %v534_v16  ;;  %v542_v21 = vmul.f32 %v540_v9, %v534_v16  ;;  %v547_v22 = vmul.f32 %v545_v10, %v534_v16  ;;  %v536_v23 = vmul.f32 %v535_v8, %v533_v17 }
  0xc4   : > { %v541_v24 = vmul.f32 %v540_v9, %v533_v17  ;;  %v546_v25 = vmul.f32 %v545_v10, %v533_v17  ;;  %v583_v52 = vperm.slane %v2166_v26, 1  ;;  %v982_v9 = vperm.slane %v2162_v18, 2 }
  0xc5   : > { %v539_v30 = vadd.f32 %v537_v20, %v2066_v35  ;;  %v544_v31 = vadd.f32 %v542_v21, %v2075_v44  ;;  %v549_v32 = vadd.f32 %v547_v22, %v521_v58  ;;  %v538_v33 = vadd.f32 %v536_v23, %v2068_v36 }
  0xc6   : > { %v543_v34 = vadd.f32 %v541_v24, %v2077_v45  ;;  %v548_v37 = vadd.f32 %v546_v25, %v520_v59  ;;  %952 = vrot.lane.b32.xlu1 %v2105_v60, %s2919_s16  ;;  %950 = vrot.lane.b32.xlu0 %v2108_v61, %s2919_s16  ;;  %v563_v35 = vstv %s2097_s17  ;;  %v568_v36 = vstv %s2112_s19  ;;  %s2224_s19 = sld [smem:[#allocation3 + $0x36]] }
  0xc7   : > { %v981_v44 = vperm.slane %v2162_v18, 1  ;;  %v980_v45 = vperm.slane %v2162_v18, 0  ;;  %v582_v10 = vperm.slane %v2166_v26, 0  ;;  %v601_v17 = vperm.slane %v598_v46, 1  ;;  %s2297_s17 = sld [smem:[#allocation3 + $0x49]] }
  0xc8   : > { %v553_v42 = vpop.permute.xlu1 %552  ;;  %v551_v43 = vpop.permute.xlu0 %550  ;;  %954 = vrot.lane.b32.xlu2 %v2117_v62, %s2919_s16  ;;  %v629_v20 = vstv %s2184_s12  ;;  %v634_v21 = vstv %s2191_s26  ;;  %v999_v18 = vperm.slane %v2209_v51, 1  ;;  %v998_v22 = vperm.slane %v2209_v51, 0  ;;  %s2923_s12 = smov 16   ;;  %s2309_s26 = sld [smem:[#allocation3 + $0x3]] }
  0xc9   : > { %v558_v2 = vsel %vm556_vm9, %v553_v42, %v2079_v48  ;;  %v557_v1 = vsel %vm556_vm9, %v551_v43, %v553_v42  ;;  %v1013_v25 = vstv %s2203_s18  ;;  %v1000_v26 = vperm.slane %v2209_v51, 2  ;;  %s2311_s18 = sld [smem:[#allocation3 + $0x4]] }
  0xca   : > { %v562_v54 = vsel %vm2043_vm5, %v1944_v3, %v558_v2  ;;  %v561_v55 = vsel %vm2037_vm4, %v1944_v3, %v557_v1  ;;  %v2218_v56 = vpop.permute.xlu2 %677 }
  0xcb   : > { %v565_v48 = vmul.f32 %v563_v35, %v562_v54  ;;  %v570_v47 = vmul.f32 %v568_v36, %v562_v54  ;;  %v575_v58 = vmul.f32 %v573_v39, %v562_v54  ;;  %v564_v59 = vmul.f32 %v563_v35, %v561_v55 }
  0xcc   : > { %v569_v7 = vmul.f32 %v568_v36, %v561_v55  ;;  %v574_v8 = vmul.f32 %v573_v39, %v561_v55  ;;  %v1014_v55 = vmul.f32 %v1013_v25, %v2091_v53 }
  0xcd   : > { %v567_v0 = vadd.f32 %v565_v48, %v539_v30  ;;  %v572_v13 = vadd.f32 %v570_v47, %v544_v31  ;;  %v577_v63 = vadd.f32 %v575_v58, %v549_v32  ;;  %v566_v6 = vadd.f32 %v564_v59, %v538_v33 }
  0xce   : > { %v571_v12 = vadd.f32 %v569_v7, %v543_v34  ;;  %v576_v16 = vadd.f32 %v574_v8, %v548_v37  ;;  %985 = vrot.lane.b32.xlu1 %v981_v44, %s2920_s15  ;;  %983 = vrot.lane.b32.xlu0 %v980_v45, %s2920_s15  ;;  %v600_v30 = vperm.slane %v598_v46, 0  ;;  %v657_v48 = vstv %s2230_s9  ;;  %s2924_s9 = smov 15  }
  0xcf   : > { %v587_v33 = vadd.f32 %v583_v52, %v567_v0  ;;  %v586_v34 = vadd.f32 %v582_v10, %v566_v6  ;;  %v596_v36 = vadd.f32 %v592_v11, %v572_v13  ;;  %v605_v39 = vadd.f32 %v601_v17, %v577_v63 }
  0xd0   : > { %v614_v23 = vpop.permute.xlu1 %613  ;;  %v612_v24 = vpop.permute.xlu0 %611  ;;  %987 = vrot.lane.b32.xlu2 %v982_v9, %s2920_s15  ;;  %v595_v45 = vadd.f32 %v591_v28, %v571_v12  ;;  %v604_v2 = vadd.f32 %v600_v30, %v576_v16  ;;  %v662_v47 = vstv %s2232_s11  ;;  %v1017_v10 = vperm.slane %v1014_v55, 1  ;;  %s2330_s11 = sld [smem:[#allocation3 + $0x10]] }
  0xd1   : > { %v619_v31 = vsel %vm617_vm10, %v614_v23, %v2110_v50  ;;  %v618_v32 = vsel %vm617_vm10, %v612_v24, %v614_v23  ;;  %v1016_v0 = vperm.slane %v1014_v55, 0 }
  0xd2   : > { %v623_v37 = vsel %vm2131_vm7, %v1944_v3, %v619_v31  ;;  %v622_v35 = vsel %vm2137_vm8, %v1944_v3, %v618_v32  ;;  %v2246_v38 = vpop.permute.xlu2 %696 }
  0xd3   : > { %v626_v40 = vmul.f32 %v624_v49, %v623_v37  ;;  %v631_v41 = vmul.f32 %v629_v20, %v623_v37  ;;  %v636_v42 = vmul.f32 %v634_v21, %v623_v37  ;;  %v625_v50 = vmul.f32 %v624_v49, %v622_v35 }
  0xd4   : > { %v630_v43 = vmul.f32 %v629_v20, %v622_v35  ;;  %v635_v44 = vmul.f32 %v634_v21, %v622_v35  ;;  %v652_v49 = vstv %s2224_s19  ;;  %s2316_s19 = sld [smem:[#allocation3 + $0x5]] }
  0xd5   : > { %v628_v1 = vadd.f32 %v626_v40, %v587_v33  ;;  %v627_v51 = vadd.f32 %v625_v50, %v586_v34  ;;  %v633_v52 = vadd.f32 %v631_v41, %v596_v36  ;;  %v638_v54 = vadd.f32 %v636_v42, %v605_v39  ;;  %v2274_v34 = vld [vmem:[#allocation2 + $0x8] sm:$0x7] }
  0xd6   : > { %1003 = vrot.lane.b32.xlu1 %v999_v18, %s2920_s15  ;;  %1001 = vrot.lane.b32.xlu0 %v998_v22, %s2920_s15  ;;  %v632_v57 = vadd.f32 %v630_v43, %v595_v45  ;;  %v637_v46 = vadd.f32 %v635_v44, %v604_v2  ;;  %v2282_v41 = vperm.slane %v2274_v34, 1  ;;  %v1090_v42 = vstv %s1539_s14  ;;  %s1541_s14 = sld [smem:[#allocation3 + $0x11]] }
  0xd7   : > { %v2288_v50 = vperm.slane %v2274_v34, 2 }
  0xd8   : > { %v642_v58 = vpop.permute.xlu1 %641  ;;  %v640_v59 = vpop.permute.xlu0 %639  ;;  %1005 = vrot.lane.b32.xlu2 %v1000_v26, %s2920_s15 }
  0xd9   : > { %v647_v7 = vsel %vm645_vm11, %v642_v58, %v2164_v19  ;;  %v646_v8 = vsel %vm645_vm11, %v640_v59, %v642_v58  ;;  %v1018_v19 = vperm.slane %v1014_v55, 2  ;;  %v735_v55 = vstv %s2295_s13  ;;  %s2374_s13 = sld [smem:[#allocation3 + $0x15]] }
  0xda   : > { %v651_v9 = vsel %vm2043_vm5, %v1944_v3, %v647_v7  ;;  %v650_v53 = vsel %vm2037_vm4, %v1944_v3, %v646_v8  ;;  %v715_v13 = vpop.permute.xlu2 %714 }
  0xdb   : > { %v654_v63 = vmul.f32 %v652_v49, %v651_v9  ;;  %v659_v6 = vmul.f32 %v657_v48, %v651_v9  ;;  %v664_v12 = vmul.f32 %v662_v47, %v651_v9  ;;  %v653_v16 = vmul.f32 %v652_v49, %v650_v53 }
  0xdc   : > { %v658_v11 = vmul.f32 %v657_v48, %v650_v53  ;;  %v663_v17 = vmul.f32 %v662_v47, %v650_v53 }
  0xdd   : > { %v656_v20 = vadd.f32 %v654_v63, %v628_v1  ;;  %v655_v21 = vadd.f32 %v653_v16, %v627_v51  ;;  %v661_v18 = vadd.f32 %v659_v6, %v633_v52  ;;  %v666_v22 = vadd.f32 %v664_v12, %v638_v54 }
  0xde   : > { %1021 = vrot.lane.b32.xlu1 %v1017_v10, %s2920_s15  ;;  %1019 = vrot.lane.b32.xlu0 %v1016_v0, %s2920_s15  ;;  %v660_v23 = vadd.f32 %v658_v11, %v632_v57  ;;  %v665_v24 = vadd.f32 %v663_v17, %v637_v46  ;;  %v740_v57 = vstv %s2297_s17  ;;  %v745_v46 = vstv %s2299_s20  ;;  %s2378_s17 = sld [smem:[#allocation3 + $0x16]] }
  0xdf   : > { %s2380_s20 = sld [smem:[#allocation3 + $0x17]] }
  0xe0   : > { %v676_v25 = vpop.permute.xlu1 %675  ;;  %v674_v26 = vpop.permute.xlu0 %673  ;;  %1023 = vrot.lane.b32.xlu2 %v1018_v19, %s2920_s15 }
  0xe1   : > { %v681_v28 = vsel %vm679_vm12, %v676_v25, %v2218_v56  ;;  %v680_v30 = vsel %vm679_vm12, %v674_v26, %v676_v25 }
  0xe2   : > { %v685_v31 = vadd.f32 %v681_v28, %v656_v20  ;;  %v684_v32 = vadd.f32 %v680_v30, %v655_v21  ;;  %v727_v33 = vpop.permute.xlu2 %726  ;;  %v767_v20 = vstv %s2309_s26  ;;  %v772_v21 = vstv %s2311_s18  ;;  %s2393_s26 = sld [smem:[#allocation3 + $0x27]] }
  0xe3   : > { %v1108_v30 = vstv %s2330_s11  ;;  %s2400_s18 = sld [smem:[#allocation3 + $0x29]] }
  0xe4   : > { %s2410_s11 = sld [smem:[#allocation3 + $0x20]] }
  0xe6   : > { %1033 = vrot.lane.b32.xlu1 %v2105_v60, %s2921_s29  ;;  %1031 = vrot.lane.b32.xlu0 %v2108_v61, %s2921_s29  ;;  %v2285_v60 = vperm.slane %v2274_v34, 0 }
  0xe8   : > { %v695_v37 = vpop.permute.xlu1 %694  ;;  %v693_v35 = vpop.permute.xlu0 %692  ;;  %1035 = vrot.lane.b32.xlu2 %v2117_v62, %s2921_s29  ;;  %v1091_v62 = vmul.f32 %v1090_v42, %v2274_v34 }
  0xe9   : > { %v699_v56 = vsel %vm679_vm12, %v695_v37, %v2246_v38  ;;  %v698_v36 = vsel %vm679_vm12, %v693_v35, %v695_v37 }
  0xea   : > { %v703_v39 = vadd.f32 %v699_v56, %v661_v18  ;;  %v702_v40 = vadd.f32 %v698_v36, %v660_v23  ;;  %v760_v61 = vpop.permute.xlu2 %759  ;;  %v1094_v51 = vperm.slane %v1091_v62, 1  ;;  %v1093_v52 = vperm.slane %v1091_v62, 0 }
  0xeb   : > { %v1095_v6 = vperm.slane %v1091_v62, 2  ;;  %v777_v18 = vstv %s2316_s19  ;;  %v1109_v62 = vmul.f32 %v1108_v30, %v2274_v34  ;;  %s2402_s19 = sld [smem:[#allocation3 + $0x1e]]  ;;  %v891_v30 = vstv %s2393_s26 }
  0xec   : > { %s2476_s26 = sld [smem:[#allocation3 + $0x3b]] }
  0xee   : > { %1065 = vrot.lane.b32.xlu1 %v2282_v41, %s2922_s10  ;;  %1063 = vrot.lane.b32.xlu0 %v2285_v60, %s2922_s10 }
  0xf0   : > { %v713_v38 = vpop.permute.xlu1 %712  ;;  %v711_v43 = vpop.permute.xlu0 %710  ;;  %1067 = vrot.lane.b32.xlu2 %v2288_v50, %s2922_s10  ;;  %s2925_s10 = smov 1  }
  0xf1   : > { %v717_v44 = vsel %vm679_vm12, %v713_v38, %v715_v13  ;;  %v716_v45 = vsel %vm679_vm12, %v711_v43, %v713_v38 }
  0xf2   : > { %v721_v2 = vadd.f32 %v717_v44, %v666_v22  ;;  %v720_v1 = vadd.f32 %v716_v45, %v665_v24  ;;  %v2305_v54 = vpop.permute.xlu2 %792 }
  0xf6   : > { %1098 = vrot.lane.b32.xlu1 %v1094_v51, %s2923_s12  ;;  %1096 = vrot.lane.b32.xlu0 %v1093_v52, %s2923_s12  ;;  %v1112_v52 = vperm.slane %v1109_v62, 1 }
  0xf8   : > { %v725_v49 = vpop.permute.xlu1 %724  ;;  %v723_v48 = vpop.permute.xlu0 %722  ;;  %1144 = vrot.lane.b32.xlu2 %v2285_v60, %s2924_s9 }
  0xf9   : > { %v730_v47 = vsel %vm728_vm13, %v725_v49, %v727_v33  ;;  %v729_v58 = vsel %vm728_vm13, %v723_v48, %v725_v49 }
  0xfa   : > { %v734_v59 = vsel %vm2131_vm7, %v1944_v3, %v730_v47  ;;  %v733_v7 = vsel %vm2137_vm8, %v1944_v3, %v729_v58  ;;  %v2328_v8 = vpop.permute.xlu2 %810 }
  0xfb   : > { %v737_v9 = vmul.f32 %v735_v55, %v734_v59  ;;  %v742_v53 = vmul.f32 %v740_v57, %v734_v59  ;;  %v747_v10 = vmul.f32 %v745_v46, %v734_v59  ;;  %v736_v0 = vmul.f32 %v735_v55, %v733_v7 }
  0xfc   : > { %v741_v13 = vmul.f32 %v740_v57, %v733_v7  ;;  %v746_v63 = vmul.f32 %v745_v46, %v733_v7  ;;  %v1126_v57 = vstv %s1541_s14  ;;  %v1113_v46 = vperm.slane %v1109_v62, 2  ;;  %s2417_s14 = sld [smem:[#allocation3 + $0x45]] }
  0xfd   : > { %v739_v12 = vadd.f32 %v737_v9, %v685_v31  ;;  %v738_v16 = vadd.f32 %v736_v0, %v684_v32  ;;  %v744_v11 = vadd.f32 %v742_v53, %v703_v39  ;;  %v749_v17 = vadd.f32 %v747_v10, %v721_v2 }
  0xfe   : > { %1148 = vrot.lane.b32.xlu1 %v2288_v50, %s2924_s9  ;;  %1146 = vrot.lane.b32.xlu0 %v2282_v41, %s2924_s9  ;;  %v743_v3 = vadd.f32 %v741_v13, %v702_v40  ;;  %v748_v19 = vadd.f32 %v746_v63, %v720_v1  ;;  %s2408_s9 = sld [smem:[#allocation3 + $0x1f]] }
 0x100   : > { %v758_v22 = vpop.permute.xlu1 %757  ;;  %v756_v23 = vpop.permute.xlu0 %755  ;;  %1100 = vrot.lane.b32.xlu2 %v1095_v6, %s2923_s12 }
 0x101   : > { %v762_v24 = vsel %vm445_vm3, %v758_v22, %v760_v61  ;;  %v761_v25 = vsel %vm445_vm3, %v756_v23, %v758_v22 }
 0x102   : > { %v766_v26 = vsel %vm2043_vm5, %v1976_v29, %v762_v24  ;;  %v765_v28 = vsel %vm2037_vm4, %v1976_v29, %v761_v25  ;;  %v829_v31 = vpop.permute.xlu2 %828 }
 0x103   : > { %v769_v32 = vmul.f32 %v767_v20, %v766_v26  ;;  %v774_v33 = vmul.f32 %v772_v21, %v766_v26  ;;  %v779_v37 = vmul.f32 %v777_v18, %v766_v26  ;;  %v768_v35 = vmul.f32 %v767_v20, %v765_v28 }
 0x104   : > { %v773_v56 = vmul.f32 %v772_v21, %v765_v28  ;;  %v778_v36 = vmul.f32 %v777_v18, %v765_v28  ;;  %v853_v20 = vstv %s2378_s17  ;;  %v858_v21 = vstv %s2380_s20  ;;  %s2445_s17 = sld [smem:[#allocation3 + $0x32]] }
 0x105   : > { %v771_v39 = vadd.f32 %v769_v32, %v739_v12  ;;  %v770_v40 = vadd.f32 %v768_v35, %v738_v16  ;;  %v776_v61 = vadd.f32 %v774_v33, %v744_v11  ;;  %v781_v42 = vadd.f32 %v779_v37, %v749_v17  ;;  %v890_v35 = vld [vmem:[#allocation2 + $0x5] sm:$0x3]  ;;  %s2474_s20 = sld [smem:[#allocation3 + $0x3a]] }
 0x106   : > { %1173 = vrot.lane.b32.xlu1 %v2282_v41, %s2925_s10  ;;  %1171 = vrot.lane.b32.xlu0 %v2285_v60, %s2925_s10  ;;  %v775_v38 = vadd.f32 %v773_v56, %v743_v3  ;;  %v780_v43 = vadd.f32 %v778_v36, %v748_v19  ;;  %v1111_v60 = vperm.slane %v1109_v62, 0  ;;  %v848_v19 = vstv %s2374_s13  ;;  %s2442_s13 = sld [smem:[#allocation3 + $0x31]] }
 0x108   : > { %v791_v44 = vpop.permute.xlu1 %790  ;;  %v789_v45 = vpop.permute.xlu0 %788  ;;  %1175 = vrot.lane.b32.xlu2 %v2288_v50, %s2925_s10  ;;  %v1127_v50 = vmul.f32 %v1126_v57, %v2274_v34  ;;  %v2376_v34 = vld [vmem:[#allocation2 + $0x9] sm:$0x7]  ;;  %s2421_s10 = sld [smem:[#allocation3 + $0x30]] }
 0x109   : > { %v795_v2 = vsel %vm479_vm2, %v791_v44, %v2305_v54  ;;  %v794_v1 = vsel %vm479_vm2, %v789_v45, %v791_v44  ;;  %v2386_v16 = vperm.slane %v2376_v34, 1  ;;  %v2389_v11 = vperm.slane %v2376_v34, 0 }
 0x10a   : > { %v2359_v51 = vadd.f32 %v795_v2, %v771_v39  ;;  %v2361_v41 = vadd.f32 %v794_v1, %v770_v40  ;;  %v841_v55 = vpop.permute.xlu2 %840  ;;  %v1130_v7 = vperm.slane %v1127_v50, 1  ;;  %v1129_v9 = vperm.slane %v1127_v50, 0 }
 0x10b   : > { %v1131_v10 = vperm.slane %v1127_v50, 2  ;;  %v2398_v3 = vperm.slane %v2376_v34, 2  ;;  %v909_v40 = vstv %s2400_s18  ;;  %v892_v45 = vmul.f32 %v891_v30, %v890_v35  ;;  %s2561_s18 = sld [smem:[#allocation3 + $0x4d]] }
 0x10c   : > { %v875_v2 = vstv %s2402_s19  ;;  %v880_v1 = vstv %s2408_s9  ;;  %s2563_s19 = sld [smem:[#allocation3 + $0x6]] }
 0x10d   : > { %s2569_s9 = sld [smem:[#allocation3 + $0x7]] }
 0x10e   : > { %1116 = vrot.lane.b32.xlu1 %v1112_v52, %s2923_s12  ;;  %1114 = vrot.lane.b32.xlu0 %v1111_v60, %s2923_s12  ;;  %v935_v50 = vstv %s2421_s10  ;;  %s2577_s10 = sld [smem:[#allocation3 + $0x19]] }
 0x110   : > { %v809_v49 = vpop.permute.xlu1 %808  ;;  %v807_v48 = vpop.permute.xlu0 %806  ;;  %1118 = vrot.lane.b32.xlu2 %v1113_v46, %s2923_s12 }
 0x111   : > { %v813_v54 = vsel %vm479_vm2, %v809_v49, %v2328_v8  ;;  %v812_v47 = vsel %vm479_vm2, %v807_v48, %v809_v49  ;;  %v1285_v49 = vstv %s2417_s14  ;;  %s2573_s14 = sld [smem:[#allocation3 + $0x18]] }
 0x112   : > { %v817_v58 = vadd.f32 %v813_v54, %v776_v61  ;;  %v816_v59 = vadd.f32 %v812_v47, %v775_v38  ;;  %v2370_v53 = vpop.permute.xlu2 %867 }
 0x116   : > { %1134 = vrot.lane.b32.xlu1 %v1130_v7, %s2923_s12  ;;  %1132 = vrot.lane.b32.xlu0 %v1129_v9, %s2923_s12 }
 0x118   : > { %v827_v8 = vpop.permute.xlu1 %826  ;;  %v825_v0 = vpop.permute.xlu0 %824  ;;  %1136 = vrot.lane.b32.xlu2 %v1131_v10, %s2923_s12  ;;  %s2395_s12 = sld [smem:[#allocation3 + $0x28]] }
 0x119   : > { %v831_v13 = vsel %vm479_vm2, %v827_v8, %v829_v31  ;;  %v830_v63 = vsel %vm479_vm2, %v825_v0, %v827_v8 }
 0x11a   : > { %v835_v6 = vadd.f32 %v831_v13, %v781_v42  ;;  %v834_v12 = vadd.f32 %v830_v63, %v780_v43  ;;  %v2391_v17 = vpop.permute.xlu2 %927  ;;  %v1286_v13 = vmul.f32 %v1285_v49, %v2376_v34 }
 0x11e   : > { %1233 = vrot.lane.b32.xlu1 %v2386_v16, %s1812_s28  ;;  %1231 = vrot.lane.b32.xlu0 %v2389_v11, %s1812_s28  ;;  %v900_v39 = vstv %s2395_s12  ;;  %s2492_s12 = sld [smem:[#allocation3 + $0x47]] }
 0x11f   : > { %v901_v60 = vmul.f32 %v900_v39, %v890_v35 }
 0x120   : > { %v839_v18 = vpop.permute.xlu1 %838  ;;  %v837_v22 = vpop.permute.xlu0 %836  ;;  %1235 = vrot.lane.b32.xlu2 %v2398_v3, %s1812_s28  ;;  %s2432_s28 = sld [smem:[#allocation3 + $0x46]] }
 0x121   : > { %v843_v23 = vsel %vm528_vm6, %v839_v18, %v841_v55  ;;  %v842_v24 = vsel %vm528_vm6, %v837_v22, %v839_v18  ;;  %v910_v55 = vmul.f32 %v909_v40, %v890_v35  ;;  %v904_v22 = vperm.slane %v901_v60, 1 }
 0x122   : > { %v847_v25 = vsel %vm2131_vm7, %v1976_v29, %v843_v23  ;;  %v846_v26 = vsel %vm2137_vm8, %v1976_v29, %v842_v24  ;;  %v2429_v28 = vpop.permute.xlu2 %954  ;;  %v940_v24 = vstv %s2442_s13  ;;  %s2582_s13 = sld [smem:[#allocation3 + $0x1a]] }
 0x123   : > { %v850_v31 = vmul.f32 %v848_v19, %v847_v25  ;;  %v855_v32 = vmul.f32 %v853_v20, %v847_v25  ;;  %v860_v33 = vmul.f32 %v858_v21, %v847_v25  ;;  %v849_v37 = vmul.f32 %v848_v19, %v846_v26 }
 0x124   : > { %v854_v56 = vmul.f32 %v853_v20, %v846_v26  ;;  %v859_v36 = vmul.f32 %v858_v21, %v846_v26  ;;  %v913_v23 = vperm.slane %v910_v55, 1  ;;  %v945_v25 = vstv %s2445_s17  ;;  %s2585_s17 = sld [smem:[#allocation3 + $0x21]] }
 0x125   : > { %v852_v61 = vadd.f32 %v850_v31, %v2359_v51  ;;  %v857_v42 = vadd.f32 %v855_v32, %v817_v58  ;;  %v862_v62 = vadd.f32 %v860_v33, %v835_v6  ;;  %v851_v38 = vadd.f32 %v849_v37, %v2361_v41 }
 0x126   : > { %v856_v43 = vadd.f32 %v854_v56, %v816_v59  ;;  %v861_v44 = vadd.f32 %v859_v36, %v834_v12  ;;  %1260 = vrot.lane.b32.xlu1 %v2386_v16, %s2919_s16  ;;  %1258 = vrot.lane.b32.xlu0 %v2389_v11, %s2919_s16  ;;  %v885_v51 = vstv %s2410_s11  ;;  %v895_v58 = vperm.slane %v892_v45, 1  ;;  %s2571_s11 = sld [smem:[#allocation3 + $0x8]] }
 0x127   : > { %v894_v59 = vperm.slane %v892_v45, 0  ;;  %v1303_v63 = vstv %s2432_s28  ;;  %v903_v26 = vperm.slane %v901_v60, 0  ;;  %v912_v30 = vperm.slane %v910_v55, 0  ;;  %s2579_s28 = sld [smem:[#allocation3 + $0x2a]] }
 0x128   : > { %v866_v52 = vpop.permute.xlu1 %865  ;;  %v864_v41 = vpop.permute.xlu0 %863  ;;  %1262 = vrot.lane.b32.xlu2 %v2398_v3, %s2919_s16  ;;  %s2470_s16 = sld [smem:[#allocation3 + $0x39]]  ;;  %v1289_v33 = vperm.slane %v1286_v13, 1  ;;  %v1288_v37 = vperm.slane %v1286_v13, 0 }
 0x129   : > { %v870_v57 = vsel %vm556_vm9, %v866_v52, %v2370_v53  ;;  %v869_v46 = vsel %vm556_vm9, %v864_v41, %v866_v52 }
 0x12a   : > { %v874_v48 = vsel %vm2043_vm5, %v1976_v29, %v870_v57  ;;  %v873_v54 = vsel %vm2037_vm4, %v1976_v29, %v869_v46  ;;  %v2462_v47 = vpop.permute.xlu2 %987 }
 0x12b   : > { %v877_v7 = vmul.f32 %v875_v2, %v874_v48  ;;  %v882_v9 = vmul.f32 %v880_v1, %v874_v48  ;;  %v887_v53 = vmul.f32 %v885_v51, %v874_v48  ;;  %v876_v10 = vmul.f32 %v875_v2, %v873_v54 }
 0x12c   : > { %v881_v8 = vmul.f32 %v880_v1, %v873_v54  ;;  %v886_v0 = vmul.f32 %v885_v51, %v873_v54  ;;  %v967_v48 = vstv %s2474_s20  ;;  %v972_v54 = vstv %s2476_s26  ;;  %s2597_s20 = sld [smem:[#allocation3 + $0x23]] }
 0x12d   : > { %v879_v6 = vadd.f32 %v877_v7, %v852_v61  ;;  %v884_v12 = vadd.f32 %v882_v9, %v857_v42  ;;  %v889_v19 = vadd.f32 %v887_v53, %v862_v62  ;;  %v878_v20 = vadd.f32 %v876_v10, %v851_v38  ;;  %s2604_s26 = sld [smem:[#allocation3 + $0x2b]] }
 0x12e   : > { %v883_v21 = vadd.f32 %v881_v8, %v856_v43  ;;  %v888_v18 = vadd.f32 %v886_v0, %v861_v44  ;;  %1341 = vrot.lane.b32.xlu1 %v2386_v16, %s2921_s29  ;;  %1339 = vrot.lane.b32.xlu0 %v2389_v11, %s2921_s29  ;;  %v1304_v16 = vmul.f32 %v1303_v63, %v2376_v34  ;;  %v1290_v11 = vperm.slane %v1286_v13, 2 }
 0x12f   : > { %v899_v36 = vadd.f32 %v895_v58, %v879_v6  ;;  %v898_v39 = vadd.f32 %v894_v59, %v878_v20  ;;  %v917_v62 = vadd.f32 %v913_v23, %v889_v19  ;;  %v962_v49 = vstv %s2470_s16  ;;  %s2587_s16 = sld [smem:[#allocation3 + $0x22]] }
 0x130   : > { %v926_v31 = vpop.permute.xlu1 %925  ;;  %v924_v32 = vpop.permute.xlu0 %923  ;;  %1343 = vrot.lane.b32.xlu2 %v2398_v3, %s2921_s29  ;;  %v908_v3 = vadd.f32 %v904_v22, %v884_v12  ;;  %v907_v1 = vadd.f32 %v903_v26, %v883_v21  ;;  %v916_v51 = vadd.f32 %v912_v30, %v888_v18  ;;  %v1307_v9 = vperm.slane %v1304_v16, 1  ;;  %s2559_s29 = sld [smem:[#allocation3 + $0x4c]] }
 0x131   : > { %v930_v35 = vsel %vm617_vm10, %v926_v31, %v2391_v17  ;;  %v929_v56 = vsel %vm617_vm10, %v924_v32, %v926_v31  ;;  %v1306_v8 = vperm.slane %v1304_v16, 0  ;;  %v1321_v0 = vstv %s2492_s12  ;;  %s2630_s12 = sld [smem:[#allocation3 + $0x2c]] }
 0x132   : > { %v934_v40 = vsel %vm2131_vm7, %v1976_v29, %v930_v35  ;;  %v933_v61 = vsel %vm2137_vm8, %v1976_v29, %v929_v56  ;;  %v2490_v42 = vpop.permute.xlu2 %1005  ;;  %v1308_v21 = vperm.slane %v1304_v16, 2 }
 0x133   : > { %v937_v38 = vmul.f32 %v935_v50, %v934_v40  ;;  %v942_v17 = vmul.f32 %v940_v24, %v934_v40  ;;  %v947_v43 = vmul.f32 %v945_v25, %v934_v40  ;;  %v936_v44 = vmul.f32 %v935_v50, %v933_v61 }
 0x134   : > { %v941_v45 = vmul.f32 %v940_v24, %v933_v61  ;;  %v946_v2 = vmul.f32 %v945_v25, %v933_v61  ;;  %v1322_v25 = vmul.f32 %v1321_v0, %v2376_v34 }
 0x135   : > { %v939_v52 = vadd.f32 %v937_v38, %v899_v36  ;;  %v938_v41 = vadd.f32 %v936_v44, %v898_v39  ;;  %v944_v60 = vadd.f32 %v942_v17, %v908_v3  ;;  %v949_v55 = vadd.f32 %v947_v43, %v917_v62 }
 0x136   : > { %1293 = vrot.lane.b32.xlu1 %v1289_v33, %s2920_s15  ;;  %1291 = vrot.lane.b32.xlu0 %v1288_v37, %s2920_s15  ;;  %v943_v57 = vadd.f32 %v941_v45, %v907_v1  ;;  %v948_v46 = vadd.f32 %v946_v2, %v916_v51  ;;  %v1325_v35 = vperm.slane %v1322_v25, 1  ;;  %v1324_v56 = vperm.slane %v1322_v25, 0 }
 0x137   : > { %v1326_v39 = vperm.slane %v1322_v25, 2 }
 0x138   : > { %v953_v58 = vpop.permute.xlu1 %952  ;;  %v951_v50 = vpop.permute.xlu0 %950  ;;  %1295 = vrot.lane.b32.xlu2 %v1290_v11, %s2920_s15 }
 0x139   : > { %v957_v59 = vsel %vm645_vm11, %v953_v58, %v2429_v28  ;;  %v956_v7 = vsel %vm645_vm11, %v951_v50, %v953_v58 }
 0x13a   : > { %v961_v53 = vsel %vm2043_vm5, %v1976_v29, %v957_v59  ;;  %v960_v10 = vsel %vm2037_vm4, %v1976_v29, %v956_v7  ;;  %v1024_v13 = vpop.permute.xlu2 %1023 }
 0x13b   : > { %v964_v63 = vmul.f32 %v962_v49, %v961_v53  ;;  %v969_v6 = vmul.f32 %v967_v48, %v961_v53  ;;  %v974_v12 = vmul.f32 %v972_v54, %v961_v53  ;;  %v963_v19 = vmul.f32 %v962_v49, %v960_v10 }
 0x13c   : > { %v968_v20 = vmul.f32 %v967_v48, %v960_v10  ;;  %v973_v28 = vmul.f32 %v972_v54, %v960_v10 }
 0x13d   : > { %v966_v18 = vadd.f32 %v964_v63, %v939_v52  ;;  %v965_v22 = vadd.f32 %v963_v19, %v938_v41  ;;  %v971_v23 = vadd.f32 %v969_v6, %v944_v60  ;;  %v976_v24 = vadd.f32 %v974_v12, %v949_v55 }
 0x13e   : > { %1311 = vrot.lane.b32.xlu1 %v1307_v9, %s2920_s15  ;;  %1309 = vrot.lane.b32.xlu0 %v1306_v8, %s2920_s15  ;;  %v970_v26 = vadd.f32 %v968_v20, %v943_v57  ;;  %v975_v30 = vadd.f32 %v973_v28, %v948_v46  ;;  %v1048_v19 = vstv %s2559_s29  ;;  %v1053_v28 = vstv %s2561_s18  ;;  %s2650_s29 = sld [smem:[#allocation3 + $0x34]] }
 0x13f   : > { %s2661_s18 = sld [smem:[#allocation3 + $0x35]] }
 0x140   : > { %v986_v31 = vpop.permute.xlu1 %985  ;;  %v984_v32 = vpop.permute.xlu0 %983  ;;  %1313 = vrot.lane.b32.xlu2 %v1308_v21, %s2920_s15 }
 0x141   : > { %v990_v33 = vsel %vm679_vm12, %v986_v31, %v2462_v47  ;;  %v989_v37 = vsel %vm679_vm12, %v984_v32, %v986_v31  ;;  %v1199_v31 = vstv %s2579_s28  ;;  %s2811_s28 = sld [smem:[#allocation3 + $0x50]] }
 0x142   : > { %v2517_v16 = vadd.f32 %v990_v33, %v966_v18  ;;  %v2519_v11 = vadd.f32 %v989_v37, %v965_v22  ;;  %v1036_v36 = vpop.permute.xlu2 %1035  ;;  %v1075_v18 = vstv %s2563_s19  ;;  %v1080_v22 = vstv %s2569_s9  ;;  %s2691_s19 = sld [smem:[#allocation3 + $0x3c]] }
 0x143   : > { %v1085_v37 = vstv %s2571_s11  ;;  %s2715_s9 = sld [smem:[#allocation3 + $0x4e]] }
 0x144   : > { %s2736_s11 = sld [smem:[#allocation3 + $0x3d]] }
 0x146   : > { %1329 = vrot.lane.b32.xlu1 %v1325_v35, %s2920_s15  ;;  %1327 = vrot.lane.b32.xlu0 %v1324_v56, %s2920_s15  ;;  %v1156_v35 = vstv %s2573_s14  ;;  %s2762_s14 = sld [smem:[#allocation3 + $0x3e]] }
 0x148   : > { %v1004_v34 = vpop.permute.xlu1 %1003  ;;  %v1002_v40 = vpop.permute.xlu0 %1001  ;;  %1331 = vrot.lane.b32.xlu2 %v1326_v39, %s2920_s15  ;;  %s2557_s15 = sld [smem:[#allocation3 + $0x4b]]  ;;  %v1166_v39 = vstv %s2582_s13 }
 0x149   : > { %v1008_v47 = vsel %vm679_vm12, %v1004_v34, %v2490_v42  ;;  %v1007_v61 = vsel %vm679_vm12, %v1002_v40, %v1004_v34  ;;  %v1183_v34 = vstv %s2585_s17 }
 0x14a   : > { %v2527_v3 = vadd.f32 %v1008_v47, %v971_v23  ;;  %v2529_v62 = vadd.f32 %v1007_v61, %v970_v26  ;;  %v1068_v38 = vpop.permute.xlu2 %1067  ;;  %v1188_v61 = vstv %s2587_s16 }
 0x14e   : > { %v1043_v6 = vstv %s2557_s15  ;;  %s2643_s15 = sld [smem:[#allocation3 + $0x33]] }
 0x150   : > { %v1022_v17 = vpop.permute.xlu1 %1021  ;;  %v1020_v43 = vpop.permute.xlu0 %1019 }
 0x151   : > { %v1026_v44 = vsel %vm679_vm12, %v1022_v17, %v1024_v13  ;;  %v1025_v45 = vsel %vm679_vm12, %v1020_v43, %v1022_v17 }
 0x152   : > { %v2533_v2 = vadd.f32 %v1026_v44, %v976_v24  ;;  %v2535_v1 = vadd.f32 %v1025_v45, %v975_v30  ;;  %v2537_v51 = vpop.permute.xlu2 %1144 }
 0x158   : > { %v1034_v42 = vpop.permute.xlu1 %1033  ;;  %v1032_v52 = vpop.permute.xlu0 %1031 }
 0x159   : > { %v1038_v8 = vsel %vm728_vm13, %v1034_v42, %v1036_v36  ;;  %v1037_v0 = vsel %vm728_vm13, %v1032_v52, %v1034_v42  ;;  %v1161_v36 = vstv %s2577_s10  ;;  %v1193_v42 = vstv %s2597_s20  ;;  %s2777_s10 = sld [smem:[#allocation3 + $0x4f]] }
 0x15a   : > { %v2539_v41 = vpop.permute.xlu2 %1100  ;;  %v1042_v12 = vsel %vm2131_vm7, %v1976_v29, %v1038_v8  ;;  %v1041_v20 = vsel %vm2137_vm8, %v1976_v29, %v1037_v0  ;;  %v2612_v29 = vld [vmem:[#allocation2 + $0x9] sm:$0x3] }
 0x15b   : > { %v1045_v21 = vmul.f32 %v1043_v6, %v1042_v12  ;;  %v1050_v24 = vmul.f32 %v1048_v19, %v1042_v12  ;;  %v1044_v25 = vmul.f32 %v1043_v6, %v1041_v20  ;;  %v1055_v32 = vmul.f32 %v1053_v28, %v1042_v12 }
 0x15c   : > { %v1049_v33 = vmul.f32 %v1048_v19, %v1041_v20  ;;  %v1054_v40 = vmul.f32 %v1053_v28, %v1041_v20  ;;  %v2628_v43 = vmul.f32 %v1199_v31, %v2612_v29 }
 0x15d   : > { %v1047_v44 = vadd.f32 %v1045_v21, %v2517_v16  ;;  %v1046_v45 = vadd.f32 %v1044_v25, %v2519_v11  ;;  %v1052_v52 = vadd.f32 %v1050_v24, %v2527_v3  ;;  %v1057_v0 = vadd.f32 %v1055_v32, %v2533_v2 }
 0x15e   : > { %v1051_v8 = vadd.f32 %v1049_v33, %v2529_v62  ;;  %v1208_v16 = vstv %s2604_s26  ;;  %v1203_v62 = vperm.slane %v2628_v43, 1  ;;  %v1202_v28 = vperm.slane %v2628_v43, 0  ;;  %s281_s26 = sand.u32 1, %s1795_s22  }
 0x15f   : > { %v2670_v21 = vmul.f32 %v1208_v16, %v2612_v29  ;;  %v1217_v32 = vstv %s2630_s12  ;;  %v1253_v16 = vstv %s2661_s18  ;;  %s1411_s13 = scalar_lea.sflag [#allocation4], %s281_s26  ;;  %s1753_s12 = scalar_lea.hbm %s2889_s6, 2 }
 0x160   : > { %v1066_v60 = vpop.permute.xlu1 %1065  ;;  %v1064_v55 = vpop.permute.xlu0 %1063 }
 0x161   : > { %v1070_v23 = vsel %vm445_vm3, %v1066_v60, %v1068_v38  ;;  %v1069_v26 = vsel %vm445_vm3, %v1064_v55, %v1066_v60 }
 0x162   : > { %v2541_v57 = vpop.permute.xlu2 %1175  ;;  %v1074_v56 = vsel %vm2043_vm5, %v2169_v27, %v1070_v23  ;;  %v1073_v47 = vsel %vm2037_vm4, %v2169_v27, %v1069_v26 }
 0x163   : > { %v1077_v60 = vmul.f32 %v1075_v18, %v1074_v56  ;;  %v1082_v6 = vmul.f32 %v1080_v22, %v1074_v56  ;;  %v1076_v12 = vmul.f32 %v1075_v18, %v1073_v47  ;;  %v1087_v11 = vmul.f32 %v1085_v37, %v1074_v56 }
 0x164   : > { %v1081_v2 = vmul.f32 %v1080_v22, %v1073_v47  ;;  %v1086_v20 = vmul.f32 %v1085_v37, %v1073_v47  ;;  %v1212_v47 = vperm.slane %v2670_v21, 1 }
 0x165   : > { %v1078_v22 = vadd.f32 %v1076_v12, %v1046_v45  ;;  %v1089_v56 = vadd.f32 %v1087_v11, %v1057_v0  ;;  %v1243_v12 = vstv %s2643_s15 }
 0x166   : > { %v1083_v37 = vadd.f32 %v1081_v2, %v1051_v8 }
 0x168   : > { %v2543_v46 = vpop.permute.xlu1 %1098  ;;  %v2545_v49 = vpop.permute.xlu0 %1096 }
 0x169   : > { %v1103_v18 = vsel %vm479_vm2, %v2543_v46, %v2539_v41  ;;  %v1102_v24 = vsel %vm479_vm2, %v2545_v49, %v2543_v46 }
 0x16a   : > { %v2547_v48 = vpop.permute.xlu2 %1118  ;;  %v1106_v45 = vadd.f32 %v1102_v24, %v1078_v22 }
 0x170   : > { %v1149_v54 = vpop.permute.xlu1 %1148  ;;  %v2549_v58 = vpop.permute.xlu0 %1146 }
 0x171   : > { %v1151_v55 = vsel %vm528_vm6, %v2549_v58, %v1149_v54  ;;  %v1150_v19 = vsel %vm528_vm6, %v2537_v51, %v2549_v58  ;;  %v1056_v54 = vadd.f32 %v1054_v40, %v2535_v1 }
 0x172   : > { %v2555_v7 = vpop.permute.xlu2 %1136  ;;  %v2656_v51 = vsel %vm2131_vm7, %v2169_v27, %v1151_v55  ;;  %v2666_v1 = vsel %vm2137_vm8, %v2169_v27, %v1150_v19  ;;  %v1248_v19 = vstv %s2650_s29 }
 0x173   : > { %v1158_v25 = vmul.f32 %v1156_v35, %v2656_v51  ;;  %v1157_v33 = vmul.f32 %v1156_v35, %v2666_v1  ;;  %v1088_v40 = vadd.f32 %v1086_v20, %v1056_v54 }
 0x178   : > { %v2551_v50 = vpop.permute.xlu1 %1173  ;;  %v2553_v59 = vpop.permute.xlu0 %1171 }
 0x179   : > { %v1178_v3 = vsel %vm556_vm9, %v2551_v50, %v2541_v57  ;;  %v1177_v58 = vsel %vm556_vm9, %v2553_v59, %v2551_v50  ;;  %v1079_v57 = vadd.f32 %v1077_v60, %v1047_v44  ;;  %v1084_v59 = vadd.f32 %v1082_v6, %v1052_v52 }
 0x17a   : > { %v2575_v10 = vpop.permute.xlu2 %1235  ;;  %v2678_v50 = vsel %vm2043_vm5, %v2169_v27, %v1178_v3  ;;  %v2687_v26 = vsel %vm2037_vm4, %v2169_v27, %v1177_v58  ;;  %v1211_v44 = vperm.slane %v2670_v21, 0  ;;  %v2701_v60 = vmul.f32 %v1217_v32, %v2612_v29 }
 0x17b   : > { %v1107_v46 = vadd.f32 %v1103_v18, %v1079_v57  ;;  %v1185_v49 = vmul.f32 %v1183_v34, %v2678_v50  ;;  %v1184_v52 = vmul.f32 %v1183_v34, %v2687_v26  ;;  %v1159_v34 = vadd.f32 %v1157_v33, %v1106_v45 }
 0x17c   : > { %v1162_v3 = vmul.f32 %v1161_v36, %v2666_v1  ;;  %v1221_v58 = vperm.slane %v2701_v60, 1  ;;  %v1190_v57 = vmul.f32 %v1188_v61, %v2678_v50  ;;  %v1270_v18 = vstv %s2691_s19  ;;  %s1419_s19 = scalar_lea.hbm %s2889_s6, %s1872_s25 }
 0x17d   : > { %v1160_v55 = vadd.f32 %v1158_v25, %v1107_v46  ;;  %v1220_v43 = vperm.slane %v2701_v60, 0 }
 0x180   : > { %v2565_v9 = vpop.permute.xlu1 %1116  ;;  %v2567_v53 = vpop.permute.xlu0 %1114 }
 0x181   : > { %v1121_v35 = vsel %vm479_vm2, %v2565_v9, %v2547_v48  ;;  %v1120_v8 = vsel %vm479_vm2, %v2567_v53, %v2565_v9  ;;  %v1187_v48 = vadd.f32 %v1185_v49, %v1160_v55  ;;  %v1186_v53 = vadd.f32 %v1184_v52, %v1159_v34 }
 0x182   : > { %v2610_v30 = vpop.permute.xlu2 %1262  ;;  %v1125_v29 = vadd.f32 %v1121_v35, %v1084_v59  ;;  %v1351_v49 = vstv %s2715_s9 }
 0x183   : > { %v1206_v32 = vadd.f32 %v1202_v28, %v1186_v53 }
 0x188   : > { %v2589_v13 = vpop.permute.xlu1 %1134  ;;  %v2591_v63 = vpop.permute.xlu0 %1132 }
 0x189   : > { %v1139_v54 = vsel %vm479_vm2, %v2589_v13, %v2555_v7  ;;  %v1138_v14 = vsel %vm479_vm2, %v2591_v63, %v2589_v13  ;;  %v1168_v13 = vmul.f32 %v1166_v39, %v2656_v51  ;;  %v1189_v63 = vmul.f32 %v1188_v61, %v2687_v26 }
 0x18a   : > { %v1344_v23 = vpop.permute.xlu2 %1343  ;;  %v1142_v35 = vadd.f32 %v1138_v14, %v1088_v40 }
 0x190   : > { %v1234_v38 = vpop.permute.xlu1 %1233  ;;  %v1232_v17 = vpop.permute.xlu0 %1231 }
 0x191   : > { %v1238_v0 = vsel %vm617_vm10, %v1234_v38, %v2575_v10  ;;  %v1237_v6 = vsel %vm617_vm10, %v1232_v17, %v1234_v38  ;;  %v1124_v10 = vadd.f32 %v1120_v8, %v1083_v37 }
 0x192   : > { %v2720_v38 = vsel %vm2131_vm7, %v2169_v27, %v1238_v0  ;;  %v2725_v17 = vsel %vm2137_vm8, %v2169_v27, %v1237_v6  ;;  %v1296_v25 = vpop.permute.xlu2 %1295 }
 0x193   : > { %v1245_v59 = vmul.f32 %v1243_v12, %v2720_v38  ;;  %v1244_v24 = vmul.f32 %v1243_v12, %v2725_v17  ;;  %v1164_v15 = vadd.f32 %v1162_v3, %v1124_v10  ;;  %v1250_v34 = vmul.f32 %v1248_v19, %v2720_v38 }
 0x194   : > { %v1249_v40 = vmul.f32 %v1248_v19, %v2725_v17 }
 0x195   : > { %v1191_v52 = vadd.f32 %v1189_v63, %v1164_v15 }
 0x197   : > { %v1215_v53 = vadd.f32 %v1211_v44, %v1191_v52  ;;  %v1361_v52 = vstv %s2811_s28  ;;  %s1423_s28 = sshll.u32 %s1419_s19, 4  ;;  %s1424_s28 = int_to_ptr.hbm [resolvable:$true] %s1423_s28 }
 0x198   : > { %v1261_v41 = vpop.permute.xlu1 %1260  ;;  %v1259_v31 = vpop.permute.xlu0 %1258  ;;  %s1747_s25 = sshra.s32 %s1424_s28, 4  ;;  %s1748_s25 = int_to_ptr.hbm [resolvable:$true] %s1747_s25 }
 0x199   : > { %v1265_v11 = vsel %vm645_vm11, %v1261_v41, %v2610_v30  ;;  %v1264_v9 = vsel %vm645_vm11, %v1259_v31, %v1261_v41  ;;  %v1163_v30 = vmul.f32 %v1161_v36, %v2656_v51  ;;  %v1207_v41 = vadd.f32 %v1203_v62, %v1187_v48  ;;  %s1749_s17 = scalar_lea.hbm %s1748_s25, 1  ;;  %p1754_p3 = scmp.lt.s32.totalorder %s1748_s25, %s2889_s6 }
 0x19a   : > { %v2746_v22 = vsel %vm2043_vm5, %v2169_v27, %v1265_v11  ;;  %v2751_v7 = vsel %vm2037_vm4, %v2169_v27, %v1264_v9  ;;  %v1143_v31 = vadd.f32 %v1139_v54, %v1089_v56  ;;  %v1167_v56 = vmul.f32 %v1166_v39, %v2666_v1  ;;  %p1750_p0 = scmp.ne.s32.totalorder %s1748_s25, %s1749_s17  ;;  %p1755_p4 = scmp.lt.s32.totalorder %s1753_s12, %s1749_s17 }
 0x19b   : > { %v1165_v36 = vadd.f32 %v1163_v30, %v1125_v29  ;;  %v1272_v33 = vmul.f32 %v1270_v18, %v2746_v22  ;;  %v1271_v37 = vmul.f32 %v1270_v18, %v2751_v7  ;;  %v1247_v45 = vadd.f32 %v1245_v59, %v1207_v41 }
 0x19c   : > { %v1170_v61 = vadd.f32 %v1168_v13, %v1143_v31  ;;  %v1275_v51 = vstv %s2736_s11  ;;  %v1195_v11 = vmul.f32 %v1193_v42, %v2678_v50  ;;  %v1169_v9 = vadd.f32 %v1167_v56, %v1142_v35  ;;  %p1751_p1 = pnand %p1750_p0, %p1889_p5  ;;  %p1756_p7 = por %p1755_p4, %p1754_p3 }
 0x19d   : > { %v1192_v28 = vadd.f32 %v1190_v57, %v1165_v36  ;;  %v1274_v8 = vadd.f32 %v1272_v33, %v1247_v45  ;;  %v1277_v10 = vmul.f32 %v1275_v51, %v2746_v22  ;;  %v1276_v3 = vmul.f32 %v1275_v51, %v2751_v7 }
 0x19e   : > { %v1197_v50 = vadd.f32 %v1195_v11, %v1170_v61  ;;  %v1280_v57 = vstv %s2762_s14  ;;  %v1251_v21 = vadd.f32 %v1249_v40, %v1215_v53  ;;  %s282_s14 = scalar_lea.vmem [#allocation9], %s281_s26  ;;  %p1752_p2 = pneg %p1751_p1 }
 0x19f   : > { %v1216_v19 = vadd.f32 %v1212_v47, %v1192_v28  ;;  %v1356_v47 = vstv %s2777_s10  ;;  %v1282_v28 = vmul.f32 %v1280_v57, %v2746_v22  ;;  %s1421_s10 = sshll.u32 %s282_s14, 4  ;;  %s1422_s10 = int_to_ptr.vmem [resolvable:$true] %s1421_s10 }
 0x1a0   : > { %v1342_v2 = vpop.permute.xlu1 %1341  ;;  %v1340_v20 = vpop.permute.xlu0 %1339  ;;  %v1225_v13 = vadd.f32 %v1221_v58, %v1197_v50  ;;  %v1379_v50 = vld [vmem:[%s2887_s4] sm:$0x1]  ;;  %p1757_p8 = pnand %p1756_p7, %p1752_p2 }
 0x1a1   : > { %v1346_v46 = vsel %vm728_vm13, %v1342_v2, %v1344_v23  ;;  %v1345_v62 = vsel %vm728_vm13, %v1340_v20, %v1342_v2  ;;  %v1246_v23 = vadd.f32 %v1244_v24, %v1206_v32  ;;  %v1314_v2 = vpop.permute.xlu2 %1313  ;;  %v1194_v20 = vmul.f32 %v1193_v42, %v2687_v26 }
 0x1a2   : > { %v2784_v1 = vsel %vm2131_vm7, %v2169_v27, %v1346_v46  ;;  %v2789_v39 = vsel %vm2137_vm8, %v2169_v27, %v1345_v62  ;;  %v1252_v18 = vadd.f32 %v1250_v34, %v1216_v19  ;;  %v1255_v24 = vmul.f32 %v1253_v16, %v2720_v38 }
 0x1a3   : > { %v1273_v0 = vadd.f32 %v1271_v37, %v1246_v23  ;;  %v1353_v5 = vmul.f32 %v1351_v49, %v2784_v1  ;;  %v1352_v27 = vmul.f32 %v1351_v49, %v2789_v39  ;;  %v1196_v59 = vadd.f32 %v1194_v20, %v1169_v9 }
 0x1a4   : > { %v1279_v15 = vadd.f32 %v1277_v10, %v1252_v18  ;;  %v1278_v42 = vadd.f32 %v1276_v3, %v1251_v21  ;;  %v1358_v32 = vmul.f32 %v1356_v47, %v2784_v1  ;;  %v1357_v33 = vmul.f32 %v1356_v47, %v2789_v39  ;;  %v1392_v47 = vld [vmem:[%s2887_s4 + $0x1] sm:$0x1]  ;;  %v1366_v21 = vld [vmem:[%s2888_s5] sm:$0x1] }
 0x1a5   : > { %v1224_v63 = vadd.f32 %v1220_v43, %v1196_v59  ;;  %v1281_v49 = vmul.f32 %v1280_v57, %v2751_v7  ;;  %v1257_v61 = vadd.f32 %v1255_v24, %v1225_v13  ;;  %v1363_v43 = vmul.f32 %v1361_v52, %v2784_v1 }
 0x1a6   : > { %v1362_v22 = vmul.f32 %v1361_v52, %v2789_v39 }
 0x1a8   : > { %v1294_v55 = vpop.permute.xlu1 %1293  ;;  %v1292_v6 = vpop.permute.xlu0 %1291 }
 0x1a9   : > { %v1298_v4 = vsel %vm679_vm12, %v1294_v55, %v1296_v25  ;;  %v1297_v12 = vsel %vm679_vm12, %v1292_v6, %v1294_v55  ;;  %v1254_v25 = vmul.f32 %v1253_v16, %v2725_v17  ;;  %v1332_v35 = vpop.permute.xlu2 %1331  ;;  %v1284_v6 = vadd.f32 %v1282_v28, %v1257_v61 }
 0x1aa   : > { %v1302_v48 = vadd.f32 %v1298_v4, %v1274_v8  ;;  %v1301_v29 = vadd.f32 %v1297_v12, %v1273_v0 }
 0x1ab   : > { %v1256_v51 = vadd.f32 %v1254_v25, %v1224_v63 }
 0x1ac   : > { %v1355_v30 = vadd.f32 %v1353_v5, %v1302_v48  ;;  %v1354_v54 = vadd.f32 %v1352_v27, %v1301_v29 }
 0x1ad   : > { %v1283_v34 = vadd.f32 %v1281_v49, %v1256_v51 }
 0x1ae   : > { %v1368_v44 = vmax.f32 %v1354_v54, 0.0  ;;  %v1369_v36 = vmax.f32 %v1355_v30, 0.0 }
 0x1b0   : > { %v1312_v41 = vpop.permute.xlu1 %1311  ;;  %v1310_v26 = vpop.permute.xlu0 %1309  ;;  %v1370_v31 = vmin.f32 %v1368_v44, 1.0  ;;  %v1371_v14 = vmin.f32 %v1369_v36, 1.0  ;;  %v1405_v36 = vld [vmem:[%s2887_s4 + $0x2] sm:$0x1] }
 0x1b1   : > { %v1316_v37 = vsel %vm679_vm12, %v1312_v41, %v1314_v2  ;;  %v1315_v46 = vsel %vm679_vm12, %v1310_v26, %v1312_v41 }
 0x1b2   : > { %v1320_v38 = vadd.f32 %v1316_v37, %v1279_v15  ;;  %v1319_v62 = vadd.f32 %v1315_v46, %v1278_v42  ;;  %v1373_v16 = vsel %vm1372_vm14, %v1370_v31, 0.0  ;;  %v1374_v17 = vsel %vm1372_vm14, %v1371_v14, 0.0 }
 0x1b3   : > { %v1375_v56 = vadd.f32 %v1374_v17, %v1373_v16 }
 0x1b4   : > { %v1360_v45 = vadd.f32 %v1358_v32, %v1320_v38  ;;  %v1359_v23 = vadd.f32 %v1357_v33, %v1319_v62 }
 0x1b5   : > { %1376 = vadd.xlane.f32.xlu0 %v1375_v56 }
 0x1b6   : > { %v1382_v55 = vmax.f32 %v1359_v23, 0.0  ;;  %v1383_v8 = vmax.f32 %v1360_v45, 0.0 }
 0x1b8   : > { %v1330_v0 = vpop.permute.xlu1 %1329  ;;  %v1328_v40 = vpop.permute.xlu0 %1327  ;;  %v1384_v60 = vmin.f32 %v1382_v55, 1.0  ;;  %v1385_v58 = vmin.f32 %v1383_v8, 1.0 }
 0x1b9   : > { %v1334_v7 = vsel %vm679_vm12, %v1330_v0, %v1332_v35  ;;  %v1333_v4 = vsel %vm679_vm12, %v1328_v40, %v1330_v0 }
 0x1ba   : > { %v1338_v12 = vadd.f32 %v1334_v7, %v1284_v6  ;;  %v1337_v5 = vadd.f32 %v1333_v4, %v1283_v34  ;;  %v1386_v27 = vsel %vm1372_vm14, %v1384_v60, 0.0  ;;  %v1387_v48 = vsel %vm1372_vm14, %v1385_v58, 0.0 }
 0x1bb   : > { %v1388_v29 = vadd.f32 %v1387_v48, %v1386_v27 }
 0x1bc   : > { %v1365_v11 = vadd.f32 %v1363_v43, %v1338_v12  ;;  %v1364_v9 = vadd.f32 %v1362_v22, %v1337_v5 }
 0x1bd   : > { %1389 = vadd.xlane.f32.xlu1 %v1388_v29 }
 0x1be   : > { %v1395_v19 = vmax.f32 %v1364_v9, 0.0  ;;  %v1396_v53 = vmax.f32 %v1365_v11, 0.0 }
 0x1c0   : > { %v1397_v1 = vmin.f32 %v1395_v19, 1.0  ;;  %v1398_v39 = vmin.f32 %v1396_v53, 1.0 }
 0x1c2   : > { %v1399_v10 = vsel %vm1372_vm14, %v1397_v1, 0.0  ;;  %v1400_v3 = vsel %vm1372_vm14, %v1398_v39, 0.0 }
 0x1c3   : > { %v1401_v30 = vadd.f32 %v1400_v3, %v1399_v10 }
 0x1c5   : > { %1402 = vadd.xlane.f32.xlu2 %v1401_v30 }
 0x228   : > { %v1377_v54 = vpop.xlane.xlu0 %1376 }
 0x229   : > { %v1378_v20 = vmul.f32 0.00390625, %v1377_v54 }
 0x22b   : > { %v1380_v18 = vmul.f32 %v1379_v50, %v1378_v20 }
 0x22d   : > { %v1381_v24 = vadd.f32 %v1380_v18, %v1366_v21 }
 0x230   : > { %v1390_v2 = vpop.xlane.xlu1 %1389 }
 0x231   : > { %v1391_v57 = vmul.f32 0.00390625, %v1390_v2 }
 0x233   : > { %v1393_v44 = vmul.f32 %v1392_v47, %v1391_v57 }
 0x235   : > { %v1394_v41 = vadd.f32 %v1393_v44, %v1381_v24 }
 0x238   : > { %v1403_v59 = vpop.xlane.xlu2 %1402 }
 0x239   : > { %v1404_v25 = vmul.f32 0.00390625, %v1403_v59 }
 0x23b   : > { %v1406_v15 = vmul.f32 %v1405_v36, %v1404_v25 }
 0x23d   : > { %v1407_v42 = vadd.f32 %v1406_v15, %v1394_v41 }
 0x23f   : > { %1409 = vst.msk [vmem:[%s282_s14] sm:$0x1] %vm1408_vm15, %v1407_v42 }
 0x240   : > { %1760 = shalt.err (!%p1757_p8)
}
 0x241   : > { %1622 = dma.vmem_to_hbm [thread:$0]  (%p1889_p5), %s1422_s10, 16, %s1424_s28, %s1411_s13  }
 0x242 PF: > { %p1644_p9 = scmp.ge.s32.totalorder %s1803_s24, 2  ;;  %s1435_s26 = sand.u32 1, %s1791_s21  }
 0x243   : > { %s1436_s18 = scalar_lea.sflag [#allocation4], %s1435_s26 }
 0x244   : > { %p1635_p10 = pnand %p1644_p9, %p1893_p6 }
 0x246   : > { %p1636_p11 = pneg %p1635_p10 }
 0x248   : > { %1786 = dma.done.wait (%p1636_p11), %s1436_s18, 16  }
 0x249   : > { %1788 = vsyncadd (%p1636_p11), %s1436_s18, 4294967280  ;;  %p18_p12 = scmp.ge.s32.totalorder %s1876_s27, 4   ;;  %s2926_s21 = smov %s1795_s22 }
 0x24a   : > { %s2927_s22 = smov %s1799_s23  ;;  %s2928_s23 = smov %s1887_s30 }
 0x24b   : > { %s2929_s24 = smov %s1876_s27  ;;  %20 = sbr.rel (!%p18_p12) target bundleno = 5 (0x5), region = 96 }
 0x250   :  { %1441 = vsyncpa [#allocation4], 1 }
 0x251   :  { %1443 = vsyncpa [#allocation4 + $0x1], 1 }
 0x252   :  { %1444 = vsyncpa [#allocation5], 1 }
 0x253   :  { %1446 = vsyncpa [#allocation5 + $0x1], 1 }
 0x254   :  { %1447 = vsyncpa [#allocation7], 1 }

</bundles_post_ra>
